<compile_context>
chip_gen: v7x
topology: tpu7x:2x2x1
jax: 0.10.0
libtpu: 0.0.40
codegen_flags: <defaults>
</compile_context>

<pallas_src>
import functools

import jax
import jax.numpy as jnp
import numpy as np
from jax import lax
from jax.experimental import pallas as pl
from jax.experimental.pallas import tpu as pltpu

# --- hyperparameters (match the PyTorch module) ------------------------------
N_EMBD = 16
BLOCK_SIZE = 4                     # sequence length T
N_HEAD = 4
HEAD_SIZE = N_EMBD // N_HEAD       # 4
FLAT = BLOCK_SIZE * N_EMBD         # 64 per batch element
PACK = 2                           # batch elements packed per kernel row
LANES = PACK * FLAT                # 128 -> full vreg width
GRP = PACK * BLOCK_SIZE * N_HEAD   # 32 score lanes per key position s
LN_EPS = 1e-5
NEG = -1e30                        # additive causal-mask value


def _round_up(x, m):
    return (x + m - 1) // m * m


# --- parameter-independent layout constants (host-side numpy) ----------------
def _static_constants():
    # per-token mean (broadcast back over the 16 channels), packed layout
    m_mean = np.kron(np.eye(PACK * BLOCK_SIZE, dtype=np.float32),
                     np.full((N_EMBD, N_EMBD), 1.0 / N_EMBD, np.float32))
    # reduce head_size d within each (p, t, h) group
    s_mat = np.kron(np.eye(N_HEAD, dtype=np.float32),
                    np.ones((HEAD_SIZE, 1), np.float32))            # (16, 4)
    # stacked over the 4 key positions:  (4*LANES, 4*GRP) = (512, 128)
    r_big = np.kron(np.eye(BLOCK_SIZE * PACK * BLOCK_SIZE, dtype=np.float32),
                    s_mat)
    e_big = np.ascontiguousarray(r_big.T)                            # (128, 512)
    # additive causal mask over score lanes: lane = s*GRP + p*16 + t*4 + h
    mask = np.zeros((1, BLOCK_SIZE * GRP), np.float32)
    for s in range(BLOCK_SIZE):
        for p in range(PACK):
            for t in range(BLOCK_SIZE):
                if t < s:
                    lo = s * GRP + p * (BLOCK_SIZE * N_HEAD) + t * N_HEAD
                    mask[0, lo:lo + N_HEAD] = NEG
    return m_mean, r_big, e_big, mask


# --- the kernel ---------------------------------------------------------------
def block_kernel(x_ref, m_ref, ln1w_ref, ln1b_ref, wbig_ref, mask_ref,
                 rbig_ref, ebig_ref, wp_ref, bp_ref,
                 f1_ref, fb1_ref, f2_ref, fb2_ref, o_ref):
    L = LANES
    x = x_ref[...]                                   # (TB, 128)
    m_mean = m_ref[...]

    def mm(a, b):
        return jnp.dot(a, b, preferred_element_type=jnp.float32)

    def ln_norm(h):
        # two *independent* matmuls; var = E[h^2] - mu^2 (no serial MXU chain).
        mu = mm(h, m_mean)
        ex2 = mm(h * h, m_mean)
        return (h - mu) * lax.rsqrt(ex2 - mu * mu + LN_EPS)

    def reduce_over_s(v, op):
        # full reduction over the 4 key positions (lane stride GRP) via cyclic
        # lane rolls -> result is broadcast back to every lane (XLU slot).
        half = BLOCK_SIZE * GRP // 2                 # 64
        quart = half // 2                            # 32
        r = op(v, pltpu.roll(v, half, 1))
        return op(r, pltpu.roll(r, quart, 1))

    # ---- x = x + MultiHeadAttention(LN1(x)) ----
    xn = ln_norm(x) * ln1w_ref[...] + ln1b_ref[...]
    qkv = mm(xn, wbig_ref[...])                      # (TB, 9L): [q*scale | k@g_s | v@g_s]
    q = qkv[:, 0:L]
    k_st = qkv[:, L:(1 + BLOCK_SIZE) * L]            # (TB, 4L)
    v_st = qkv[:, (1 + BLOCK_SIZE) * L:]             # (TB, 4L)
    q_t = jnp.concatenate([q] * BLOCK_SIZE, axis=1)  # (TB, 4L)

    sc = mm(q_t * k_st, rbig_ref[...]) + mask_ref[...]   # (TB, 128) scores
    m = reduce_over_s(sc, jnp.maximum)
    e = jnp.exp(sc - m)                              # EUP
    den = reduce_over_s(e, jnp.add)
    wei = e * pl.reciprocal(den, approx=True)        # softmax over key positions

    prod = mm(wei, ebig_ref[...]) * v_st             # (TB, 4L)
    att = (prod[:, 0:L] + prod[:, L:2 * L]) + (prod[:, 2 * L:3 * L] + prod[:, 3 * L:4 * L])
    h1 = x + mm(att, wp_ref[...]) + bp_ref[...]      # proj (+bias); dropout = id

    # ---- x = x + FeedForward(LN2(x)) ----  (LN2 scale/bias folded into f1/fb1)
    z2 = ln_norm(h1)
    f = jnp.maximum(mm(z2, f1_ref[...]) + fb1_ref[...], 0.0)
    o_ref[...] = h1 + mm(f, f2_ref[...]) + fb2_ref[...]   # dropout = id


# --- wrapper -------------------------------------------------------------------
@functools.partial(jax.jit, static_argnames=("max_rows",))
def block_forward(x, params, *, max_rows=512):
    """x: (B, T=4, C=16) float32 -> (B, 4, 16) float32 (Block.forward, eval)."""
    B, T, C = x.shape
    assert T == BLOCK_SIZE and C == N_EMBD
    f32 = jnp.float32
    x = x.astype(f32)

    # ---- constants: layout matrices + packed / fused weights ----
    m_np, r_np, e_np, mask_np = _static_constants()
    m_mean, r_big, e_big, mask = map(jnp.asarray, (m_np, r_np, e_np, mask_np))

    eye_t = jnp.eye(BLOCK_SIZE, dtype=f32)
    eye_p = jnp.eye(PACK, dtype=f32)
    eye_pt = jnp.eye(PACK * BLOCK_SIZE, dtype=f32)

    def bd64(w16):                       # (16,16) -> token-block-diag (64,64)
        return jnp.kron(eye_t, w16.astype(f32))

    def bd_pack(w16):                    # (16,16) -> packed block-diag (128,128)
        return jnp.kron(eye_pt, w16.astype(f32))

    def tile_vec(v16):                   # (16,) -> (1, 128)
        return jnp.tile(v16.astype(f32), PACK * BLOCK_SIZE).reshape(1, LANES)

    def gather64(s):                     # replicate token s into every token slot
        a = jnp.zeros((BLOCK_SIZE, BLOCK_SIZE), f32).at[s, :].set(1.0)
        return jnp.kron(a, jnp.eye(N_EMBD, dtype=f32))

    scale = jnp.float32(HEAD_SIZE ** -0.5)
    q64 = bd64(params["wq"]) * scale               # attention scale folded in
    k64 = bd64(params["wk"])
    v64 = bd64(params["wv"])
    chunks = ([q64]
              + [k64 @ gather64(s) for s in range(BLOCK_SIZE)]
              + [v64 @ gather64(s) for s in range(BLOCK_SIZE)])
    w_big = jnp.concatenate([jnp.kron(eye_p, c) for c in chunks], axis=1)  # (128, 1152)

    # LN2 affine folded into the first FF layer
    f1_16 = params["ln2_w"][:, None] * params["ff_w1"]
    fb1_16 = params["ff_b1"] + params["ln2_b"] @ params["ff_w1"]

    consts = [
        m_mean,
        tile_vec(params["ln1_w"]), tile_vec(params["ln1_b"]),
        w_big, mask, r_big, e_big,
        bd_pack(params["w_proj"]), tile_vec(params["b_proj"]),
        bd_pack(f1_16), tile_vec(fb1_16),
        bd_pack(params["ff_w2"]), tile_vec(params["ff_b2"]),
    ]

    # ---- batch packing / tiling (minimal padding, even grid for v7x) ----
    rows = -(-B // PACK)                         # packed rows needed
    rows8 = _round_up(rows, 8)
    nsteps = -(-rows8 // max_rows)
    if rows8 >= 16:                              # keep two TensorCores balanced
        nsteps = max(nsteps, 2)
        nsteps += nsteps % 2
    tb = _round_up(-(-rows8 // nsteps), 8)
    rows_pad = tb * nsteps
    b_pad = rows_pad * PACK

    xf = x.reshape(B, FLAT)
    if b_pad != B:
        xf = jnp.pad(xf, ((0, b_pad - B), (0, 0)))   # padded rows dropped below
    xp = xf.reshape(rows_pad, LANES)

    in_specs = [pl.BlockSpec((tb, LANES), lambda i: (i, 0))]
    in_specs += [pl.BlockSpec(c.shape, lambda i: (0, 0)) for c in consts]

    out = pl.pallas_call(
        block_kernel,
        out_shape=jax.ShapeDtypeStruct((rows_pad, LANES), f32),
        grid=(nsteps,),
        in_specs=in_specs,
        out_specs=pl.BlockSpec((tb, LANES), lambda i: (i, 0)),
        compiler_params=pltpu.CompilerParams(
            dimension_semantics=("parallel",)),
    )(xp, *consts)

    return out.reshape(b_pad, FLAT)[:B].reshape(B, T, C)


# --- parameters (weights in (in, out) math form) -------------------------------
def init_params(key):
    ks = jax.random.split(key, 12)
    std = 0.2
    f32 = jnp.float32

    def lin(k, fi, fo):
        return jax.random.normal(k, (fi, fo), f32) * std

    def vec(k, n, scale=0.1):
        return jax.random.normal(k, (n,), f32) * scale

    return dict(
        ln1_w=1.0 + vec(ks[0], N_EMBD), ln1_b=vec(ks[1], N_EMBD),
        # columns grouped per head: wq[:, h*4:(h+1)*4] is head h's query weight
        wq=lin(ks[2], N_EMBD, N_EMBD), wk=lin(ks[3], N_EMBD, N_EMBD),
        wv=lin(ks[4], N_EMBD, N_EMBD),
        w_proj=lin(ks[5], N_EMBD, N_EMBD), b_proj=vec(ks[6], N_EMBD),
        ln2_w=1.0 + vec(ks[7], N_EMBD), ln2_b=vec(ks[8], N_EMBD),
        ff_w1=lin(ks[9], N_EMBD, N_EMBD), ff_b1=vec(ks[10], N_EMBD),
        ff_w2=lin(ks[11], N_EMBD, N_EMBD), ff_b2=jnp.zeros((N_EMBD,), f32),
    )


# --- pure-JAX reference (sanity check) ------------------------------------------
def reference_block(x, p):
    B, T, C = x.shape

    def ln(z, w, b):
        mu = z.mean(-1, keepdims=True)
        var = ((z - mu) ** 2).mean(-1, keepdims=True)
        return (z - mu) / jnp.sqrt(var + LN_EPS) * w + b

    xn = ln(x, p["ln1_w"], p["ln1_b"])
    q = (xn @ p["wq"]).reshape(B, T, N_HEAD, HEAD_SIZE).transpose(0, 2, 1, 3)
    k = (xn @ p["wk"]).reshape(B, T, N_HEAD, HEAD_SIZE).transpose(0, 2, 1, 3)
    v = (xn @ p["wv"]).reshape(B, T, N_HEAD, HEAD_SIZE).transpose(0, 2, 1, 3)
    sc = jnp.einsum("bhtd,bhsd->bhts", q, k) * HEAD_SIZE ** -0.5
    mask = jnp.tril(jnp.ones((T, T), bool))
    sc = jnp.where(mask, sc, -jnp.inf)
    wei = jax.nn.softmax(sc, axis=-1)
    o = jnp.einsum("bhts,bhsd->bhtd", wei, v).transpose(0, 2, 1, 3).reshape(B, T, C)
    x = x + o @ p["w_proj"] + p["b_proj"]
    xn2 = ln(x, p["ln2_w"], p["ln2_b"])
    f = jax.nn.relu(xn2 @ p["ff_w1"] + p["ff_b1"])
    f = f @ p["ff_w2"] + p["ff_b2"]
    return x + f


if __name__ == "__main__":
    key = jax.random.PRNGKey(0)
    pkey, xkey, xkey2 = jax.random.split(key, 3)
    params = init_params(pkey)

    # small shape consistent with the module: (B, block_size, n_embd)
    B = 8
    x = jax.random.normal(xkey, (B, BLOCK_SIZE, N_EMBD), jnp.float32)
    out = jax.block_until_ready(block_forward(x, params))
    ref = reference_block(x, params)
    assert out.shape == (B, BLOCK_SIZE, N_EMBD)
    np.testing.assert_allclose(np.asarray(out), np.asarray(ref),
                               atol=1e-2, rtol=1e-2)

    # odd + larger batch: exercises lane-packing pad, batch grid, even split
    B2 = 1041
    x2 = jax.random.normal(xkey2, (B2, BLOCK_SIZE, N_EMBD), jnp.float32)
    out2 = jax.block_until_ready(block_forward(x2, params))
    ref2 = reference_block(x2, params)
    np.testing.assert_allclose(np.asarray(out2), np.asarray(ref2),
                               atol=1e-2, rtol=1e-2)

    print("KERNEL_OK")
</pallas_src>

<mosaic_0001>
module attributes {stable_mosaic.version = 11 : i64} {
  func.func @block_kernel(%arg0: i32, %arg1: memref<8x128xf32, #tpu.memory_space<vmem>>, %arg2: memref<128x128xf32, #tpu.memory_space<vmem>>, %arg3: memref<1x128xf32, #tpu.memory_space<vmem>>, %arg4: memref<1x128xf32, #tpu.memory_space<vmem>>, %arg5: memref<128x1152xf32, #tpu.memory_space<vmem>>, %arg6: memref<1x128xf32, #tpu.memory_space<vmem>>, %arg7: memref<512x128xf32, #tpu.memory_space<vmem>>, %arg8: memref<128x512xf32, #tpu.memory_space<vmem>>, %arg9: memref<128x128xf32, #tpu.memory_space<vmem>>, %arg10: memref<1x128xf32, #tpu.memory_space<vmem>>, %arg11: memref<128x128xf32, #tpu.memory_space<vmem>>, %arg12: memref<1x128xf32, #tpu.memory_space<vmem>>, %arg13: memref<128x128xf32, #tpu.memory_space<vmem>>, %arg14: memref<1x128xf32, #tpu.memory_space<vmem>>, %arg15: memref<8x128xf32, #tpu.memory_space<vmem>>) attributes {dimension_semantics = [#tpu.dimension_semantics<parallel>], iteration_bounds = array<i64: 1>, scalar_prefetch = 0 : i64, scratch_operands = 0 : i64, tpu.core_type = #tpu.core_type<tc>, window_params = [{transform_indices = @transform_0, window_bounds = array<i64: 8, 128>}, {pipeline_mode = #tpu.pipeline_mode<synchronous>, transform_indices = @transform_1, window_bounds = array<i64: 128, 128>}, {pipeline_mode = #tpu.pipeline_mode<synchronous>, transform_indices = @transform_2, window_bounds = array<i64: 1, 128>}, {pipeline_mode = #tpu.pipeline_mode<synchronous>, transform_indices = @transform_3, window_bounds = array<i64: 1, 128>}, {pipeline_mode = #tpu.pipeline_mode<synchronous>, transform_indices = @transform_4, window_bounds = array<i64: 128, 1152>}, {pipeline_mode = #tpu.pipeline_mode<synchronous>, transform_indices = @transform_5, window_bounds = array<i64: 1, 128>}, {pipeline_mode = #tpu.pipeline_mode<synchronous>, transform_indices = @transform_6, window_bounds = array<i64: 512, 128>}, {pipeline_mode = #tpu.pipeline_mode<synchronous>, transform_indices = @transform_7, window_bounds = array<i64: 128, 512>}, {pipeline_mode = #tpu.pipeline_mode<synchronous>, transform_indices = @transform_8, window_bounds = array<i64: 128, 128>}, {pipeline_mode = #tpu.pipeline_mode<synchronous>, transform_indices = @transform_9, window_bounds = array<i64: 1, 128>}, {pipeline_mode = #tpu.pipeline_mode<synchronous>, transform_indices = @transform_10, window_bounds = array<i64: 128, 128>}, {pipeline_mode = #tpu.pipeline_mode<synchronous>, transform_indices = @transform_11, window_bounds = array<i64: 1, 128>}, {pipeline_mode = #tpu.pipeline_mode<synchronous>, transform_indices = @transform_12, window_bounds = array<i64: 128, 128>}, {pipeline_mode = #tpu.pipeline_mode<synchronous>, transform_indices = @transform_13, window_bounds = array<i64: 1, 128>}, {transform_indices = @transform_14, window_bounds = array<i64: 8, 128>}]} {
    %c0 = arith.constant 0 : index
    %c0_0 = arith.constant 0 : index
    %0 = vector.load %arg1[%c0, %c0_0] : memref<8x128xf32, #tpu.memory_space<vmem>>, vector<8x128xf32>
    %c0_1 = arith.constant 0 : index
    %c0_2 = arith.constant 0 : index
    %1 = vector.load %arg2[%c0_1, %c0_2] : memref<128x128xf32, #tpu.memory_space<vmem>>, vector<128x128xf32>
    %cst = arith.constant dense<0.000000e+00> : vector<8x128xf32>
    %2 = tpu.matmul %0, %1, %cst {dimension_numbers = #tpu.dot_dimension_numbers<[1], [0], [0], [1], [0, 0, 1, 1], [], []>} : vector<8x128xf32>, vector<128x128xf32>, vector<8x128xf32> -> vector<8x128xf32>
    %3 = arith.mulf %0, %0 : vector<8x128xf32>
    %cst_3 = arith.constant dense<0.000000e+00> : vector<8x128xf32>
    %4 = tpu.matmul %3, %1, %cst_3 {dimension_numbers = #tpu.dot_dimension_numbers<[1], [0], [0], [1], [0, 0, 1, 1], [], []>} : vector<8x128xf32>, vector<128x128xf32>, vector<8x128xf32> -> vector<8x128xf32>
    %5 = arith.subf %0, %2 : vector<8x128xf32>
    %6 = arith.mulf %2, %2 : vector<8x128xf32>
    %7 = arith.subf %4, %6 : vector<8x128xf32>
    %cst_4 = arith.constant 9.99999974E-6 : f32
    %8 = vector.broadcast %cst_4 : f32 to vector<8x128xf32>
    %9 = arith.addf %7, %8 : vector<8x128xf32>
    %10 = math.rsqrt %9 : vector<8x128xf32>
    %11 = arith.mulf %5, %10 : vector<8x128xf32>
    %c0_5 = arith.constant 0 : index
    %c0_6 = arith.constant 0 : index
    %12 = vector.load %arg3[%c0_5, %c0_6] : memref<1x128xf32, #tpu.memory_space<vmem>>, vector<1x128xf32>
    %13 = vector.broadcast %12 : vector<1x128xf32> to vector<8x128xf32>
    %14 = arith.mulf %11, %13 : vector<8x128xf32>
    %c0_7 = arith.constant 0 : index
    %c0_8 = arith.constant 0 : index
    %15 = vector.load %arg4[%c0_7, %c0_8] : memref<1x128xf32, #tpu.memory_space<vmem>>, vector<1x128xf32>
    %16 = vector.broadcast %15 : vector<1x128xf32> to vector<8x128xf32>
    %17 = arith.addf %14, %16 : vector<8x128xf32>
    %c0_9 = arith.constant 0 : index
    %c0_10 = arith.constant 0 : index
    %18 = vector.load %arg5[%c0_9, %c0_10] : memref<128x1152xf32, #tpu.memory_space<vmem>>, vector<128x1152xf32>
    %cst_11 = arith.constant dense<0.000000e+00> : vector<8x1152xf32>
    %19 = tpu.matmul %17, %18, %cst_11 {dimension_numbers = #tpu.dot_dimension_numbers<[1], [0], [0], [1], [0, 0, 1, 1], [], []>} : vector<8x128xf32>, vector<128x1152xf32>, vector<8x1152xf32> -> vector<8x1152xf32>
    %20 = vector.extract_strided_slice %19 {offsets = [0, 0], sizes = [8, 128], strides = [1, 1]} : vector<8x1152xf32> to vector<8x128xf32>
    %21 = vector.extract_strided_slice %19 {offsets = [0, 128], sizes = [8, 512], strides = [1, 1]} : vector<8x1152xf32> to vector<8x512xf32>
    %22 = vector.extract_strided_slice %19 {offsets = [0, 640], sizes = [8, 512], strides = [1, 1]} : vector<8x1152xf32> to vector<8x512xf32>
    %23 = tpu.concatenate %20, %20, %20, %20 in 1 : vector<8x128xf32>, vector<8x128xf32>, vector<8x128xf32>, vector<8x128xf32> -> vector<8x512xf32>
    %24 = arith.mulf %23, %21 : vector<8x512xf32>
    %c0_12 = arith.constant 0 : index
    %c0_13 = arith.constant 0 : index
    %25 = vector.load %arg7[%c0_12, %c0_13] : memref<512x128xf32, #tpu.memory_space<vmem>>, vector<512x128xf32>
    %cst_14 = arith.constant dense<0.000000e+00> : vector<8x128xf32>
    %26 = tpu.matmul %24, %25, %cst_14 {dimension_numbers = #tpu.dot_dimension_numbers<[1], [0], [0], [1], [0, 0, 1, 1], [], []>} : vector<8x512xf32>, vector<512x128xf32>, vector<8x128xf32> -> vector<8x128xf32>
    %c0_15 = arith.constant 0 : index
    %c0_16 = arith.constant 0 : index
    %27 = vector.load %arg6[%c0_15, %c0_16] : memref<1x128xf32, #tpu.memory_space<vmem>>, vector<1x128xf32>
    %28 = vector.broadcast %27 : vector<1x128xf32> to vector<8x128xf32>
    %29 = arith.addf %26, %28 : vector<8x128xf32>
    %c64_i32 = arith.constant 64 : i32
    %30 = tpu.dynamic_rotate %29 by %c64_i32 dim 1 : vector<8x128xf32>, i32 -> vector<8x128xf32>
    %31 = arith.maximumf %29, %30 : vector<8x128xf32>
    %c32_i32 = arith.constant 32 : i32
    %32 = tpu.dynamic_rotate %31 by %c32_i32 dim 1 : vector<8x128xf32>, i32 -> vector<8x128xf32>
    %33 = arith.maximumf %31, %32 : vector<8x128xf32>
    %34 = arith.subf %29, %33 : vector<8x128xf32>
    %35 = math.exp %34 : vector<8x128xf32>
    %c64_i32_17 = arith.constant 64 : i32
    %36 = tpu.dynamic_rotate %35 by %c64_i32_17 dim 1 : vector<8x128xf32>, i32 -> vector<8x128xf32>
    %37 = arith.addf %35, %36 : vector<8x128xf32>
    %c32_i32_18 = arith.constant 32 : i32
    %38 = tpu.dynamic_rotate %37 by %c32_i32_18 dim 1 : vector<8x128xf32>, i32 -> vector<8x128xf32>
    %39 = arith.addf %37, %38 : vector<8x128xf32>
    %40 = tpu.reciprocal %39 {approx = true} : vector<8x128xf32> -> vector<8x128xf32>
    %41 = arith.mulf %35, %40 : vector<8x128xf32>
    %c0_19 = arith.constant 0 : index
    %c0_20 = arith.constant 0 : index
    %42 = vector.load %arg8[%c0_19, %c0_20] : memref<128x512xf32, #tpu.memory_space<vmem>>, vector<128x512xf32>
    %cst_21 = arith.constant dense<0.000000e+00> : vector<8x512xf32>
    %43 = tpu.matmul %41, %42, %cst_21 {dimension_numbers = #tpu.dot_dimension_numbers<[1], [0], [0], [1], [0, 0, 1, 1], [], []>} : vector<8x128xf32>, vector<128x512xf32>, vector<8x512xf32> -> vector<8x512xf32>
    %44 = arith.mulf %43, %22 : vector<8x512xf32>
    %45 = vector.extract_strided_slice %44 {offsets = [0, 0], sizes = [8, 128], strides = [1, 1]} : vector<8x512xf32> to vector<8x128xf32>
    %46 = vector.extract_strided_slice %44 {offsets = [0, 128], sizes = [8, 128], strides = [1, 1]} : vector<8x512xf32> to vector<8x128xf32>
    %47 = arith.addf %45, %46 : vector<8x128xf32>
    %48 = vector.extract_strided_slice %44 {offsets = [0, 256], sizes = [8, 128], strides = [1, 1]} : vector<8x512xf32> to vector<8x128xf32>
    %49 = vector.extract_strided_slice %44 {offsets = [0, 384], sizes = [8, 128], strides = [1, 1]} : vector<8x512xf32> to vector<8x128xf32>
    %50 = arith.addf %48, %49 : vector<8x128xf32>
    %51 = arith.addf %47, %50 : vector<8x128xf32>
    %c0_22 = arith.constant 0 : index
    %c0_23 = arith.constant 0 : index
    %52 = vector.load %arg9[%c0_22, %c0_23] : memref<128x128xf32, #tpu.memory_space<vmem>>, vector<128x128xf32>
    %cst_24 = arith.constant dense<0.000000e+00> : vector<8x128xf32>
    %53 = tpu.matmul %51, %52, %cst_24 {dimension_numbers = #tpu.dot_dimension_numbers<[1], [0], [0], [1], [0, 0, 1, 1], [], []>} : vector<8x128xf32>, vector<128x128xf32>, vector<8x128xf32> -> vector<8x128xf32>
    %54 = arith.addf %0, %53 : vector<8x128xf32>
    %c0_25 = arith.constant 0 : index
    %c0_26 = arith.constant 0 : index
    %55 = vector.load %arg10[%c0_25, %c0_26] : memref<1x128xf32, #tpu.memory_space<vmem>>, vector<1x128xf32>
    %56 = vector.broadcast %55 : vector<1x128xf32> to vector<8x128xf32>
    %57 = arith.addf %54, %56 : vector<8x128xf32>
    %cst_27 = arith.constant dense<0.000000e+00> : vector<8x128xf32>
    %58 = tpu.matmul %57, %1, %cst_27 {dimension_numbers = #tpu.dot_dimension_numbers<[1], [0], [0], [1], [0, 0, 1, 1], [], []>} : vector<8x128xf32>, vector<128x128xf32>, vector<8x128xf32> -> vector<8x128xf32>
    %59 = arith.mulf %57, %57 : vector<8x128xf32>
    %cst_28 = arith.constant dense<0.000000e+00> : vector<8x128xf32>
    %60 = tpu.matmul %59, %1, %cst_28 {dimension_numbers = #tpu.dot_dimension_numbers<[1], [0], [0], [1], [0, 0, 1, 1], [], []>} : vector<8x128xf32>, vector<128x128xf32>, vector<8x128xf32> -> vector<8x128xf32>
    %61 = arith.subf %57, %58 : vector<8x128xf32>
    %62 = arith.mulf %58, %58 : vector<8x128xf32>
    %63 = arith.subf %60, %62 : vector<8x128xf32>
    %cst_29 = arith.constant 9.99999974E-6 : f32
    %64 = vector.broadcast %cst_29 : f32 to vector<8x128xf32>
    %65 = arith.addf %63, %64 : vector<8x128xf32>
    %66 = math.rsqrt %65 : vector<8x128xf32>
    %67 = arith.mulf %61, %66 : vector<8x128xf32>
    %c0_30 = arith.constant 0 : index
    %c0_31 = arith.constant 0 : index
    %68 = vector.load %arg11[%c0_30, %c0_31] : memref<128x128xf32, #tpu.memory_space<vmem>>, vector<128x128xf32>
    %cst_32 = arith.constant dense<0.000000e+00> : vector<8x128xf32>
    %69 = tpu.matmul %67, %68, %cst_32 {dimension_numbers = #tpu.dot_dimension_numbers<[1], [0], [0], [1], [0, 0, 1, 1], [], []>} : vector<8x128xf32>, vector<128x128xf32>, vector<8x128xf32> -> vector<8x128xf32>
    %c0_33 = arith.constant 0 : index
    %c0_34 = arith.constant 0 : index
    %70 = vector.load %arg12[%c0_33, %c0_34] : memref<1x128xf32, #tpu.memory_space<vmem>>, vector<1x128xf32>
    %71 = vector.broadcast %70 : vector<1x128xf32> to vector<8x128xf32>
    %72 = arith.addf %69, %71 : vector<8x128xf32>
    %cst_35 = arith.constant 0.000000e+00 : f32
    %73 = vector.broadcast %cst_35 : f32 to vector<8x128xf32>
    %74 = arith.maximumf %72, %73 : vector<8x128xf32>
    %c0_36 = arith.constant 0 : index
    %c0_37 = arith.constant 0 : index
    %75 = vector.load %arg13[%c0_36, %c0_37] : memref<128x128xf32, #tpu.memory_space<vmem>>, vector<128x128xf32>
    %cst_38 = arith.constant dense<0.000000e+00> : vector<8x128xf32>
    %76 = tpu.matmul %74, %75, %cst_38 {dimension_numbers = #tpu.dot_dimension_numbers<[1], [0], [0], [1], [0, 0, 1, 1], [], []>} : vector<8x128xf32>, vector<128x128xf32>, vector<8x128xf32> -> vector<8x128xf32>
    %77 = arith.addf %57, %76 : vector<8x128xf32>
    %c0_39 = arith.constant 0 : index
    %c0_40 = arith.constant 0 : index
    %78 = vector.load %arg14[%c0_39, %c0_40] : memref<1x128xf32, #tpu.memory_space<vmem>>, vector<1x128xf32>
    %79 = vector.broadcast %78 : vector<1x128xf32> to vector<8x128xf32>
    %80 = arith.addf %77, %79 : vector<8x128xf32>
    %c0_41 = arith.constant 0 : index
    %c0_42 = arith.constant 0 : index
    %81 = vector.load %arg15[%c0_41, %c0_42] : memref<8x128xf32, #tpu.memory_space<vmem>>, vector<8x128xf32>
    tpu.vector_store %arg15[%c0_41, %c0_42], %80 {strides = array<i32>} : memref<8x128xf32, #tpu.memory_space<vmem>>, vector<8x128xf32>,
    return
  }
  func.func @transform_0(%arg0: i32) -> (i32, i32) {
    %c0_i32 = arith.constant 0 : i32
    %c0_i32_0 = arith.constant 0 : i32
    return %arg0, %c0_i32 : i32, i32
  }
  func.func @transform_1(%arg0: i32) -> (i32, i32) {
    %c0_i32 = arith.constant 0 : i32
    %c0_i32_0 = arith.constant 0 : i32
    %c0_i32_1 = arith.constant 0 : i32
    return %c0_i32, %c0_i32_0 : i32, i32
  }
  func.func @transform_2(%arg0: i32) -> (i32, i32) {
    %c0_i32 = arith.constant 0 : i32
    %c0_i32_0 = arith.constant 0 : i32
    %c0_i32_1 = arith.constant 0 : i32
    return %c0_i32, %c0_i32_0 : i32, i32
  }
  func.func @transform_3(%arg0: i32) -> (i32, i32) {
    %c0_i32 = arith.constant 0 : i32
    %c0_i32_0 = arith.constant 0 : i32
    %c0_i32_1 = arith.constant 0 : i32
    return %c0_i32, %c0_i32_0 : i32, i32
  }
  func.func @transform_4(%arg0: i32) -> (i32, i32) {
    %c0_i32 = arith.constant 0 : i32
    %c0_i32_0 = arith.constant 0 : i32
    %c0_i32_1 = arith.constant 0 : i32
    return %c0_i32, %c0_i32_0 : i32, i32
  }
  func.func @transform_5(%arg0: i32) -> (i32, i32) {
    %c0_i32 = arith.constant 0 : i32
    %c0_i32_0 = arith.constant 0 : i32
    %c0_i32_1 = arith.constant 0 : i32
    return %c0_i32, %c0_i32_0 : i32, i32
  }
  func.func @transform_6(%arg0: i32) -> (i32, i32) {
    %c0_i32 = arith.constant 0 : i32
    %c0_i32_0 = arith.constant 0 : i32
    %c0_i32_1 = arith.constant 0 : i32
    return %c0_i32, %c0_i32_0 : i32, i32
  }
  func.func @transform_7(%arg0: i32) -> (i32, i32) {
    %c0_i32 = arith.constant 0 : i32
    %c0_i32_0 = arith.constant 0 : i32
    %c0_i32_1 = arith.constant 0 : i32
    return %c0_i32, %c0_i32_0 : i32, i32
  }
  func.func @transform_8(%arg0: i32) -> (i32, i32) {
    %c0_i32 = arith.constant 0 : i32
    %c0_i32_0 = arith.constant 0 : i32
    %c0_i32_1 = arith.constant 0 : i32
    return %c0_i32, %c0_i32_0 : i32, i32
  }
  func.func @transform_9(%arg0: i32) -> (i32, i32) {
    %c0_i32 = arith.constant 0 : i32
    %c0_i32_0 = arith.constant 0 : i32
    %c0_i32_1 = arith.constant 0 : i32
    return %c0_i32, %c0_i32_0 : i32, i32
  }
  func.func @transform_10(%arg0: i32) -> (i32, i32) {
    %c0_i32 = arith.constant 0 : i32
    %c0_i32_0 = arith.constant 0 : i32
    %c0_i32_1 = arith.constant 0 : i32
    return %c0_i32, %c0_i32_0 : i32, i32
  }
  func.func @transform_11(%arg0: i32) -> (i32, i32) {
    %c0_i32 = arith.constant 0 : i32
    %c0_i32_0 = arith.constant 0 : i32
    %c0_i32_1 = arith.constant 0 : i32
    return %c0_i32, %c0_i32_0 : i32, i32
  }
  func.func @transform_12(%arg0: i32) -> (i32, i32) {
    %c0_i32 = arith.constant 0 : i32
    %c0_i32_0 = arith.constant 0 : i32
    %c0_i32_1 = arith.constant 0 : i32
    return %c0_i32, %c0_i32_0 : i32, i32
  }
  func.func @transform_13(%arg0: i32) -> (i32, i32) {
    %c0_i32 = arith.constant 0 : i32
    %c0_i32_0 = arith.constant 0 : i32
    %c0_i32_1 = arith.constant 0 : i32
    return %c0_i32, %c0_i32_0 : i32, i32
  }
  func.func @transform_14(%arg0: i32) -> (i32, i32) {
    %c0_i32 = arith.constant 0 : i32
    %c0_i32_0 = arith.constant 0 : i32
    return %arg0, %c0_i32 : i32, i32
  }
}

</mosaic_0001>

<bundles_post_ra>
// kernel: tile.43
= control target key start
LH: loop header
LB: loop body
LE: loop exit
PB: predicated region body
PF: predicated region fallthrough
CT: control target
= control target key end

     0   :  { %s22_s0 = inlined_call_operand.vmem [shape: f32[16], index: 0, kind: input, shape index: {}]   ;;  %s23_s1 = inlined_call_operand.vmem [shape: f32[8,16], index: 1, kind: output, shape index: {}]  }
   0x1   :  { %v4_v0 = vld [vmem:[%s22_s0] ss:$0 sm:$0xff] }
   0x2   :  { %5 = vst [vmem:[%s23_s1] sm:$0xff] %v4_v0 }

// kernel: tile.44
= control target key start
LH: loop header
LB: loop body
LE: loop exit
PB: predicated region body
PF: predicated region fallthrough
CT: control target
= control target key end

     0   :  { %s67_s10 = smov 112   ;;  %s68_s11 = smov 80   ;;  %vm3_vm0 = vcmask 130048   ;;  %vm9_vm1 = vcmask 1048448   ;;  %vm15_vm2 = vcmask 917248   ;;  %vm21_vm3 = vcmask 786048   ;;  %s111_s0 = inlined_call_operand.vmem [shape: f32[8,16], index: 0, kind: input, shape index: {}]   ;;  %s112_s1 = inlined_call_operand.vmem [shape: f32[1,128], index: 1, kind: output, shape index: {}]  }
   0x1   :  { %v53_v0 = vld [vmem:[%s111_s0 + $0x7] sm:$0x1]   ;;  %v55_v1 = vld [vmem:[%s111_s0 + $0x5] sm:$0x1]   ;;  %v54_v2 = vld [vmem:[%s111_s0 + $0x6] sm:$0x1]  }
   0x2   :  { %7 = vrot.lane.b32.xlu0 %v53_v0, %s67_s10  ;;  %19 = vrot.lane.b32.xlu1 %v55_v1, %s68_s11  ;;  %v56_v3 = vld [vmem:[%s111_s0 + $0x4] sm:$0x1]   ;;  %v2_v4 = vld [vmem:[%s111_s0] sm:$0x1]   ;;  %s69_s18 = smov 96   ;;  %s70_s19 = smov 64  }
   0x3   :  { %4 = vst.msk [vmem:[#allocation0] sm:$0x1] %vm3_vm0, %v2_v4   ;;  %v57_v5 = vld [vmem:[%s111_s0 + $0x3] sm:$0x1]   ;;  %v58_v6 = vld [vmem:[%s111_s0 + $0x2] sm:$0x1]  }
   0x4   :  { %s71_s24 = smov 48   ;;  %s72_s25 = smov 32   ;;  %v59_v7 = vld [vmem:[%s111_s0 + $0x1] sm:$0x1]   ;;  %vm27_vm4 = vcmask 654848   ;;  %vm33_vm5 = vcmask 523648  }
   0x5   :  { %s73_s0 = smov 16   ;;  %vm39_vm6 = vcmask 392448   ;;  %vm45_vm7 = vcmask 261248  }
   0x6   :  { %13 = vrot.lane.b32.xlu0 %v54_v2, %s69_s18  ;;  %25 = vrot.lane.b32.xlu1 %v56_v3, %s70_s19 }
   0xa   :  { %31 = vrot.lane.b32.xlu0 %v57_v5, %s71_s24  ;;  %37 = vrot.lane.b32.xlu1 %v58_v6, %s72_s25 }
   0xe   :  { %43 = vrot.lane.b32.xlu0 %v59_v7, %s73_s0 }
  0x74   :  { %v8_v8 = vpop.permute.xlu0 %7   ;;  %v20_v9 = vpop.permute.xlu1 %19  }
  0x75   :  { %10 = vst.msk [vmem:[#allocation0] sm:$0x1] %vm9_vm1, %v8_v8  }
  0x78   :  { %v14_v10 = vpop.permute.xlu0 %13   ;;  %v26_v11 = vpop.permute.xlu1 %25  }
  0x79   :  { %16 = vst.msk [vmem:[#allocation0] sm:$0x1] %vm15_vm2, %v14_v10  }
  0x7a   :  { %22 = vst.msk [vmem:[#allocation0] sm:$0x1] %vm21_vm3, %v20_v9  }
  0x7b   :  { %28 = vst.msk [vmem:[#allocation0] sm:$0x1] %vm27_vm4, %v26_v11  }
  0x7c   :  { %v32_v12 = vpop.permute.xlu0 %31   ;;  %v38_v13 = vpop.permute.xlu1 %37  }
  0x7d   :  { %34 = vst.msk [vmem:[#allocation0] sm:$0x1] %vm33_vm5, %v32_v12  }
  0x7e   :  { %40 = vst.msk [vmem:[#allocation0] sm:$0x1] %vm39_vm6, %v38_v13  }
  0x80   :  { %v44_v14 = vpop.permute.xlu0 %43  }
  0x81   :  { %46 = vst.msk [vmem:[#allocation0] sm:$0x1] %vm45_vm7, %v44_v14  }
  0x88   :  { %v50_v15 = vld [vmem:[#allocation0] sm:$0x1] }
  0x89   :  { %52 = vst [vmem:[%s112_s1] sm:$0x1] %v50_v15 }

// kernel: block_forward.1
= control target key start
LH: loop header
LB: loop body
LE: loop exit
PB: predicated region body
PF: predicated region fallthrough
CT: control target
= control target key end

     0   :  { %v2560_v0 = vmov 0.0|0.0   ;;  %vm2561_vm0 = vmmov 0   ;;  %v2562_v6 = vmov 0.0   ;;  %s2563_s27 = smov 64   ;;  %s2564_s28 = smov 32   ;;  %s3850_s1 = inlined_call_operand.vmem [shape: f32[128,128], index: 1, kind: input, shape index: {}]   ;;  %s3851_s4 = inlined_call_operand.vmem [shape: f32[128,1152], index: 4, kind: input, shape index: {}]   ;;  %s3852_s0 = inlined_call_operand.vmem [shape: f32[8,128], index: 0, kind: input, shape index: {}]   ;;  %s3853_s2 = inlined_call_operand.vmem [shape: f32[1,128], index: 2, kind: input, shape index: {}]   ;;  %s3854_s3 = inlined_call_operand.vmem [shape: f32[1,128], index: 3, kind: input, shape index: {}]   ;;  %s3855_s6 = inlined_call_operand.vmem [shape: f32[512,128], index: 6, kind: input, shape index: {}]   ;;  %s3856_s5 = inlined_call_operand.vmem [shape: f32[1,128], index: 5, kind: input, shape index: {}]   ;;  %s3857_s7 = inlined_call_operand.vmem [shape: f32[128,512], index: 7, kind: input, shape index: {}]   ;;  %s3858_s8 = inlined_call_operand.vmem [shape: f32[128,128], index: 8, kind: input, shape index: {}]   ;;  %s3859_s10 = inlined_call_operand.vmem [shape: f32[128,128], index: 10, kind: input, shape index: {}]   ;;  %s3860_s9 = inlined_call_operand.vmem [shape: f32[1,128], index: 9, kind: input, shape index: {}]   ;;  %s3861_s12 = inlined_call_operand.vmem [shape: f32[128,128], index: 12, kind: input, shape index: {}]   ;;  %s3862_s11 = inlined_call_operand.vmem [shape: f32[1,128], index: 11, kind: input, shape index: {}]   ;;  %s3863_s13 = inlined_call_operand.vmem [shape: f32[1,128], index: 13, kind: input, shape index: {}]   ;;  %s3864_s14 = inlined_call_operand.vmem [shape: f32[8,128], index: 14, kind: output, shape index: {}]  }
   0x1   :  { %2098 = vmatprep.subr.bf16.mxu0 %v2560_v0  ;;  %v48_v1 = vld [vmem:[%s3850_s1] sm:$0xff]  ;;  %v49_v2 = vld [vmem:[%s3850_s1 + $0x8] sm:$0xff]  ;;  %2122 = vmatprep.subr.bf16.mxu1 %v2560_v0  ;;  %v50_v3 = vld [vmem:[%s3850_s1 + $0x10] sm:$0xff] }
   0x2   :  { %v2651_v4 = vpack.c.bf16 %v49_v2, %v48_v1  ;;  %v51_v5 = vld [vmem:[%s3850_s1 + $0x18] sm:$0xff]  ;;  %1850 = vmatprep.mubr.msk.f32.mxu0 %vm2561_vm0, %v2562_v6  ;;  %1885 = vmatprep.mubr.msk.f32.mxu1 %vm2561_vm0, %v2562_v6  ;;  %v52_v8 = vld [vmem:[%s3850_s1 + $0x20] sm:$0xff]  ;;  %v53_v9 = vld [vmem:[%s3850_s1 + $0x28] sm:$0xff] }
   0x3   :  { %v2662_v7 = vpack.c.bf16 %v51_v5, %v50_v3  ;;  %v2674_v10 = vpack.c.bf16 %v53_v9, %v52_v8  ;;  %v54_v11 = vld [vmem:[%s3850_s1 + $0x30] sm:$0xff]  ;;  %v55_v12 = vld [vmem:[%s3850_s1 + $0x38] sm:$0xff]  ;;  %v56_v14 = vld [vmem:[%s3850_s1 + $0x40] sm:$0xff] }
   0x4   :  { %2100 = vmatpush3.bf16.msra.mxu0 %v2651_v4  ;;  %2124 = vmatpush3.bf16.msra.mxu1 %v2651_v4  ;;  %v2686_v13 = vpack.c.bf16 %v55_v12, %v54_v11  ;;  %v57_v15 = vld [vmem:[%s3850_s1 + $0x48] sm:$0xff]  ;;  %v58_v17 = vld [vmem:[%s3850_s1 + $0x50] sm:$0xff]  ;;  %v59_v18 = vld [vmem:[%s3850_s1 + $0x58] sm:$0xff] }
   0x5   :  { %2101 = vmatprep.subr.bf16.mxu0 %v2560_v0  ;;  %2125 = vmatprep.subr.bf16.mxu1 %v2560_v0  ;;  %v2698_v16 = vpack.c.bf16 %v57_v15, %v56_v14  ;;  %v2710_v19 = vpack.c.bf16 %v59_v18, %v58_v17  ;;  %v60_v20 = vld [vmem:[%s3850_s1 + $0x60] sm:$0xff]  ;;  %v61_v21 = vld [vmem:[%s3850_s1 + $0x68] sm:$0xff]  ;;  %v62_v23 = vld [vmem:[%s3850_s1 + $0x70] sm:$0xff] }
   0x6   :  { %v2722_v22 = vpack.c.bf16 %v61_v21, %v60_v20  ;;  %v63_v24 = vld [vmem:[%s3850_s1 + $0x78] sm:$0xff]  ;;  %v228_v25 = vld [vmem:[%s3851_s4 + $0x8] sm:$0xff]  ;;  %v237_v26 = vld [vmem:[%s3851_s4 + $0x50] sm:$0xff] }
   0x7   :  { %v230_v27 = vld [vmem:[%s3851_s4 + $0x18] sm:$0xff]  ;;  %v239_v28 = vld [vmem:[%s3851_s4 + $0x60] sm:$0xff]  ;;  %v2746_v29 = vpack.c.bf16 %v63_v24, %v62_v23  ;;  %v236_v32 = vld [vmem:[%s3851_s4 + $0x48] sm:$0xff]  ;;  %v2146_v33 = vpack.c.bf16 %v237_v26, %v228_v25 }
   0x8   :  { %2103 = vmatpush3.bf16.msra.mxu0 %v2662_v7  ;;  %2127 = vmatpush3.bf16.msra.mxu1 %v2662_v7  ;;  %v2751_v30 = vld [vmem:[%s3852_s0] sm:$0xff]  ;;  %v2178_v34 = vpack.c.bf16 %v239_v28, %v230_v27  ;;  %v229_v35 = vld [vmem:[%s3851_s4 + $0x10] sm:$0xff]  ;;  %v238_v36 = vld [vmem:[%s3851_s4 + $0x58] sm:$0xff] }
   0x9   :  { %2104 = vmatprep.subr.bf16.mxu0 %v2560_v0  ;;  %2128 = vmatprep.subr.bf16.mxu1 %v2560_v0  ;;  %v227_v31 = vld [vmem:[%s3851_s4] sm:$0xff]  ;;  %v246_v37 = vld [vmem:[%s3851_s4 + $0x98] sm:$0xff]  ;;  %v248_v39 = vld [vmem:[%s3851_s4 + $0xa8] sm:$0xff]  ;;  %v134_v41 = vmul.f32 %v2751_v30, %v2751_v30  ;;  %v2180_v43 = vpack.c.bf16 %v238_v36, %v229_v35 }
   0xa   :  { %v255_v38 = vld [vmem:[%s3851_s4 + $0xe0] sm:$0xff]  ;;  %v257_v40 = vld [vmem:[%s3851_s4 + $0xf0] sm:$0xff]  ;;  %v2148_v42 = vpack.c.bf16 %v236_v32, %v227_v31  ;;  %v254_v45 = vld [vmem:[%s3851_s4 + $0xd8] sm:$0xff] }
   0xb   :  { %v245_v44 = vld [vmem:[%s3851_s4 + $0x90] sm:$0xff]  ;;  %v2150_v46 = vpack.c.bf16 %v255_v38, %v246_v37  ;;  %v2182_v47 = vpack.c.bf16 %v257_v40, %v248_v39  ;;  %v247_v48 = vld [vmem:[%s3851_s4 + $0xa0] sm:$0xff]  ;;  %v256_v49 = vld [vmem:[%s3851_s4 + $0xe8] sm:$0xff] }
   0xc   :  { %2106 = vmatpush3.bf16.msra.mxu0 %v2674_v10  ;;  %2130 = vmatpush3.bf16.msra.mxu1 %v2674_v10  ;;  %v264_v50 = vld [vmem:[%s3851_s4 + $0x128] sm:$0xff]  ;;  %v273_v51 = vld [vmem:[%s3851_s4 + $0x170] sm:$0xff]  ;;  %v266_v52 = vld [vmem:[%s3851_s4 + $0x138] sm:$0xff]  ;;  %v2152_v54 = vpack.c.bf16 %v254_v45, %v245_v44  ;;  %v2184_v55 = vpack.c.bf16 %v256_v49, %v247_v48 }
   0xd   :  { %2107 = vmatprep.subr.bf16.mxu0 %v2560_v0  ;;  %2131 = vmatprep.subr.bf16.mxu1 %v2560_v0  ;;  %v275_v53 = vld [vmem:[%s3851_s4 + $0x180] sm:$0xff]  ;;  %v2154_v56 = vpack.c.bf16 %v273_v51, %v264_v50  ;;  %v272_v59 = vld [vmem:[%s3851_s4 + $0x168] sm:$0xff]  ;;  %v265_v60 = vld [vmem:[%s3851_s4 + $0x130] sm:$0xff] }
   0xe   :  { %v2186_v57 = vpack.c.bf16 %v275_v53, %v266_v52  ;;  %v263_v58 = vld [vmem:[%s3851_s4 + $0x120] sm:$0xff]  ;;  %v274_v62 = vld [vmem:[%s3851_s4 + $0x178] sm:$0xff]  ;;  %v284_v3 = vld [vmem:[%s3851_s4 + $0x1c8] sm:$0xff] }
   0xf   :  { %v2156_v61 = vpack.c.bf16 %v272_v59, %v263_v58  ;;  %v2188_v63 = vpack.c.bf16 %v274_v62, %v265_v60  ;;  %v282_v1 = vld [vmem:[%s3851_s4 + $0x1b8] sm:$0xff]  ;;  %v291_v2 = vld [vmem:[%s3851_s4 + $0x200] sm:$0xff]  ;;  %v293_v8 = vld [vmem:[%s3851_s4 + $0x210] sm:$0xff] }
  0x10   :  { %2109 = vmatpush3.bf16.msra.mxu0 %v2686_v13  ;;  %2133 = vmatpush3.bf16.msra.mxu1 %v2686_v13  ;;  %v2158_v5 = vpack.c.bf16 %v291_v2, %v282_v1  ;;  %v281_v9 = vld [vmem:[%s3851_s4 + $0x1b0] sm:$0xff]  ;;  %v290_v11 = vld [vmem:[%s3851_s4 + $0x1f8] sm:$0xff]  ;;  %v2190_v12 = vpack.c.bf16 %v293_v8, %v284_v3  ;;  %v283_v15 = vld [vmem:[%s3851_s4 + $0x1c0] sm:$0xff] }
  0x11   :  { %2110 = vmatprep.subr.bf16.mxu0 %v2560_v0  ;;  %2134 = vmatprep.subr.bf16.mxu1 %v2560_v0  ;;  %v2160_v14 = vpack.c.bf16 %v290_v11, %v281_v9  ;;  %v292_v17 = vld [vmem:[%s3851_s4 + $0x208] sm:$0xff]  ;;  %v309_v21 = vld [vmem:[%s3851_s4 + $0x290] sm:$0xff]  ;;  %v302_v23 = vld [vmem:[%s3851_s4 + $0x258] sm:$0xff] }
  0x12   :  { %v2192_v18 = vpack.c.bf16 %v292_v17, %v283_v15  ;;  %v300_v20 = vld [vmem:[%s3851_s4 + $0x248] sm:$0xff]  ;;  %v311_v25 = vld [vmem:[%s3851_s4 + $0x2a0] sm:$0xff]  ;;  %v301_v32 = vld [vmem:[%s3851_s4 + $0x250] sm:$0xff] }
  0x13   :  { %v2162_v24 = vpack.c.bf16 %v309_v21, %v300_v20  ;;  %v299_v26 = vld [vmem:[%s3851_s4 + $0x240] sm:$0xff]  ;;  %v308_v27 = vld [vmem:[%s3851_s4 + $0x288] sm:$0xff]  ;;  %v2194_v28 = vpack.c.bf16 %v311_v25, %v302_v23  ;;  %v318_v35 = vld [vmem:[%s3851_s4 + $0x2d8] sm:$0xff] }
  0x14   :  { %2112 = vmatpush3.bf16.msra.mxu0 %v2698_v16  ;;  %2136 = vmatpush3.bf16.msra.mxu1 %v2698_v16  ;;  %v2164_v31 = vpack.c.bf16 %v308_v27, %v299_v26  ;;  %v327_v36 = vld [vmem:[%s3851_s4 + $0x320] sm:$0xff]  ;;  %v320_v37 = vld [vmem:[%s3851_s4 + $0x2e8] sm:$0xff]  ;;  %v329_v39 = vld [vmem:[%s3851_s4 + $0x330] sm:$0xff] }
  0x15   :  { %2113 = vmatprep.subr.bf16.mxu0 %v2560_v0  ;;  %2137 = vmatprep.subr.bf16.mxu1 %v2560_v0  ;;  %v2166_v38 = vpack.c.bf16 %v327_v36, %v318_v35  ;;  %v317_v40 = vld [vmem:[%s3851_s4 + $0x2d0] sm:$0xff]  ;;  %v319_v44 = vld [vmem:[%s3851_s4 + $0x2e0] sm:$0xff]  ;;  %v328_v45 = vld [vmem:[%s3851_s4 + $0x328] sm:$0xff] }
  0x16   :  { %v345_v48 = vld [vmem:[%s3851_s4 + $0x3b0] sm:$0xff]  ;;  %v338_v49 = vld [vmem:[%s3851_s4 + $0x378] sm:$0xff]  ;;  %v347_v51 = vld [vmem:[%s3851_s4 + $0x3c0] sm:$0xff] }
  0x17   :  { %v335_v52 = vld [vmem:[%s3851_s4 + $0x360] sm:$0xff]  ;;  %v344_v53 = vld [vmem:[%s3851_s4 + $0x3a8] sm:$0xff]  ;;  %v354_v59 = vld [vmem:[%s3851_s4 + $0x3f8] sm:$0xff] }
  0x18   :  { %2115 = vmatpush3.bf16.msra.mxu0 %v2710_v19  ;;  %2139 = vmatpush3.bf16.msra.mxu1 %v2710_v19  ;;  %v363_v60 = vld [vmem:[%s3851_s4 + $0x440] sm:$0xff]  ;;  %v353_v1 = vld [vmem:[%s3851_s4 + $0x3f0] sm:$0xff]  ;;  %v362_v2 = vld [vmem:[%s3851_s4 + $0x438] sm:$0xff] }
  0x19   :  { %2116 = vmatprep.subr.bf16.mxu0 %v2560_v0  ;;  %2140 = vmatprep.subr.bf16.mxu1 %v2560_v0  ;;  %v2174_v62 = vpack.c.bf16 %v363_v60, %v354_v59  ;;  %v355_v8 = vld [vmem:[%s3851_s4 + $0x400] sm:$0xff]  ;;  %v364_v9 = vld [vmem:[%s3851_s4 + $0x448] sm:$0xff]  ;;  %v234_v15 = vld [vmem:[%s3851_s4 + $0x38] sm:$0xff] }
  0x1a   :  { %v232_v11 = vld [vmem:[%s3851_s4 + $0x28] sm:$0xff]  ;;  %v243_v17 = vld [vmem:[%s3851_s4 + $0x80] sm:$0xff] }
  0x1b   :  { %v2242_v20 = vpack.c.bf16 %v243_v17, %v234_v15  ;;  %v231_v35 = vld [vmem:[%s3851_s4 + $0x20] sm:$0xff]  ;;  %v240_v36 = vld [vmem:[%s3851_s4 + $0x68] sm:$0xff] }
  0x1c   :  { %2118 = vmatpush3.bf16.msra.mxu0 %v2722_v22  ;;  %2142 = vmatpush3.bf16.msra.mxu1 %v2722_v22  ;;  %v267_v59 = vld [vmem:[%s3851_s4 + $0x140] sm:$0xff]  ;;  %v276_v60 = vld [vmem:[%s3851_s4 + $0x188] sm:$0xff] }
  0x1d   :  { %2119 = vmatprep.subr.bf16.mxu0 %v2560_v0  ;;  %2143 = vmatprep.subr.bf16.mxu1 %v2560_v0 }
  0x20   :  { %2121 = vmatpush3.bf16.msra.mxu0 %v2746_v29  ;;  %2145 = vmatpush3.bf16.msra.mxu1 %v2746_v29 }
  0x21   :  { %2147 = vmatprep.subr.bf16.mxu0 %v2146_v33  ;;  %2179 = vmatprep.subr.bf16.mxu1 %v2178_v34  ;;  %v310_v33 = vld [vmem:[%s3851_s4 + $0x298] sm:$0xff] }
  0x22   :  { %v2196_v34 = vpack.c.bf16 %v310_v33, %v301_v32  ;;  %v1606_v32 = vld [vmem:[%s3853_s2] ss:$0 sm:$0xff] }
  0x23   :  { %1851 = vmatmul.mubr.f32.vlgmr.msra.gmra.mrb[0].mxu0 %v2751_v30  ;;  %1886 = vmatmul.mubr.f32.vlgmr.msra.gmra.mrb[0].mxu1 %v134_v41  ;;  %v326_v41 = vld [vmem:[%s3851_s4 + $0x318] sm:$0xff] }
  0x24   :  { %2149 = vmatpush1.bf16.msra.mxu0 %v2148_v42  ;;  %2181 = vmatpush1.bf16.msra.mxu1 %v2180_v43  ;;  %v2198_v42 = vpack.c.bf16 %v329_v39, %v320_v37  ;;  %v2168_v43 = vpack.c.bf16 %v326_v41, %v317_v40  ;;  %v250_v39 = vld [vmem:[%s3851_s4 + $0xb8] sm:$0xff]  ;;  %v259_v40 = vld [vmem:[%s3851_s4 + $0x100] sm:$0xff]  ;;  %v252_v41 = vld [vmem:[%s3851_s4 + $0xc8] sm:$0xff] }
  0x25   :  { %2151 = vmatprep.subr.bf16.mxu0 %v2150_v46  ;;  %2183 = vmatprep.subr.bf16.mxu1 %v2182_v47  ;;  %v2200_v46 = vpack.c.bf16 %v328_v45, %v319_v44  ;;  %v336_v47 = vld [vmem:[%s3851_s4 + $0x368] sm:$0xff]  ;;  %v2212_v44 = vpack.c.bf16 %v240_v36, %v231_v35  ;;  %v314_v35 = vld [vmem:[%s3851_s4 + $0x2b8] sm:$0xff] }
  0x26   :  { %435 = vmatprep.mubr.f32.mxu0 %v2562_v6  ;;  %506 = vmatprep.mubr.f32.mxu1 %v2562_v6  ;;  %v2170_v50 = vpack.c.bf16 %v345_v48, %v336_v47  ;;  %v258_v47 = vld [vmem:[%s3851_s4 + $0xf8] sm:$0xff] }
  0x27   :  { %v322_v36 = vld [vmem:[%s3851_s4 + $0x2f8] sm:$0xff] }
  0x28   :  { %2153 = vmatpush1.bf16.msra.mxu0 %v2152_v54  ;;  %2185 = vmatpush1.bf16.msra.mxu1 %v2184_v55  ;;  %v2202_v54 = vpack.c.bf16 %v347_v51, %v338_v49  ;;  %v2172_v55 = vpack.c.bf16 %v344_v53, %v335_v52  ;;  %v2214_v49 = vpack.c.bf16 %v259_v40, %v250_v39  ;;  %v251_v51 = vld [vmem:[%s3851_s4 + $0xc0] sm:$0xff]  ;;  %v260_v52 = vld [vmem:[%s3851_s4 + $0x108] sm:$0xff] }
  0x29   :  { %2155 = vmatprep.subr.bf16.mxu0 %v2154_v56  ;;  %2187 = vmatprep.subr.bf16.mxu1 %v2186_v57  ;;  %v337_v56 = vld [vmem:[%s3851_s4 + $0x370] sm:$0xff]  ;;  %v346_v57 = vld [vmem:[%s3851_s4 + $0x3b8] sm:$0xff]  ;;  %v268_v53 = vld [vmem:[%s3851_s4 + $0x148] sm:$0xff] }
  0x2a   :  { %v2204_v58 = vpack.c.bf16 %v346_v57, %v337_v56  ;;  %v279_v56 = vld [vmem:[%s3851_s4 + $0x1a0] sm:$0xff] }
  0x2c   :  { %2157 = vmatpush1.bf16.msra.mxu0 %v2156_v61  ;;  %2189 = vmatpush1.bf16.msra.mxu1 %v2188_v63  ;;  %v356_v61 = vld [vmem:[%s3851_s4 + $0x408] sm:$0xff]  ;;  %v365_v63 = vld [vmem:[%s3851_s4 + $0x450] sm:$0xff] }
  0x2d   :  { %2159 = vmatprep.subr.bf16.mxu0 %v2158_v5  ;;  %2191 = vmatprep.subr.bf16.mxu1 %v2190_v12  ;;  %v2206_v3 = vpack.c.bf16 %v365_v63, %v356_v61  ;;  %v2176_v5 = vpack.c.bf16 %v362_v2, %v353_v1  ;;  %v2208_v12 = vpack.c.bf16 %v364_v9, %v355_v8  ;;  %v269_v63 = vld [vmem:[%s3851_s4 + $0x150] sm:$0xff]  ;;  %v278_v1 = vld [vmem:[%s3851_s4 + $0x198] sm:$0xff] }
  0x2e   :  { %v286_v2 = vld [vmem:[%s3851_s4 + $0x1d8] sm:$0xff]  ;;  %v297_v8 = vld [vmem:[%s3851_s4 + $0x230] sm:$0xff]  ;;  %v2220_v9 = vpack.c.bf16 %v276_v60, %v267_v59 }
  0x2f   :  { %v350_v59 = vld [vmem:[%s3851_s4 + $0x3d8] sm:$0xff] }
  0x30   :  { %2161 = vmatpush1.bf16.msra.mxu0 %v2160_v14  ;;  %2193 = vmatpush1.bf16.msra.mxu1 %v2192_v18  ;;  %v241_v14 = vld [vmem:[%s3851_s4 + $0x70] sm:$0xff]  ;;  %v358_v60 = vld [vmem:[%s3851_s4 + $0x418] sm:$0xff] }
  0x31   :  { %2163 = vmatprep.subr.bf16.mxu0 %v2162_v24  ;;  %2195 = vmatprep.subr.bf16.mxu1 %v2194_v28  ;;  %v2210_v18 = vpack.c.bf16 %v241_v14, %v232_v11  ;;  %v2252_v11 = vpack.c.bf16 %v278_v1, %v269_v63  ;;  %v294_v14 = vld [vmem:[%s3851_s4 + $0x218] sm:$0xff]  ;;  %v369_v63 = vld [vmem:[%s3851_s4 + $0x470] sm:$0xff] }
  0x34   :  { %2165 = vmatpush1.bf16.msra.mxu0 %v2164_v31  ;;  %2197 = vmatpush1.bf16.msra.mxu1 %v2196_v34  ;;  %v1607_v34 = vld [vmem:[%s3854_s3] ss:$0 sm:$0xff] }
  0x35   :  { %2167 = vmatprep.subr.bf16.mxu0 %v2166_v38  ;;  %2199 = vmatprep.subr.bf16.mxu1 %v2198_v42  ;;  %v242_v38 = vld [vmem:[%s3851_s4 + $0x78] sm:$0xff]  ;;  %v261_v42 = vld [vmem:[%s3851_s4 + $0x110] sm:$0xff] }
  0x38   :  { %2169 = vmatpush1.bf16.msra.mxu0 %v2168_v43  ;;  %2201 = vmatpush1.bf16.msra.mxu1 %v2200_v46  ;;  %v249_v46 = vld [vmem:[%s3851_s4 + $0xb0] sm:$0xff] }
  0x39   :  { %2171 = vmatprep.subr.bf16.mxu0 %v2170_v50  ;;  %2203 = vmatprep.subr.bf16.mxu1 %v2202_v54  ;;  %v2246_v50 = vpack.c.bf16 %v261_v42, %v252_v41  ;;  %v277_v54 = vld [vmem:[%s3851_s4 + $0x190] sm:$0xff]  ;;  %v2216_v57 = vpack.c.bf16 %v258_v47, %v249_v46  ;;  %v330_v42 = vld [vmem:[%s3851_s4 + $0x338] sm:$0xff]  ;;  %v332_v46 = vld [vmem:[%s3851_s4 + $0x348] sm:$0xff] }
  0x3a   :  { %v2218_v61 = vpack.c.bf16 %v277_v54, %v268_v53  ;;  %v321_v41 = vld [vmem:[%s3851_s4 + $0x2f0] sm:$0xff]  ;;  %v340_v47 = vld [vmem:[%s3851_s4 + $0x388] sm:$0xff]  ;;  %v339_v54 = vld [vmem:[%s3851_s4 + $0x380] sm:$0xff] }
  0x3c   :  { %2173 = vmatpush1.bf16.msra.mxu0 %v2172_v55  ;;  %2205 = vmatpush1.bf16.msra.mxu1 %v2204_v58  ;;  %v270_v55 = vld [vmem:[%s3851_s4 + $0x158] sm:$0xff]  ;;  %v2248_v58 = vpack.c.bf16 %v260_v52, %v251_v51  ;;  %v351_v51 = vld [vmem:[%s3851_s4 + $0x3e0] sm:$0xff]  ;;  %v2232_v52 = vpack.c.bf16 %v330_v42, %v321_v41 }
  0x3d   :  { %2175 = vmatprep.subr.bf16.mxu0 %v2174_v62  ;;  %2207 = vmatprep.subr.bf16.mxu1 %v2206_v3  ;;  %v2250_v62 = vpack.c.bf16 %v279_v56, %v270_v55  ;;  %v295_v3 = vld [vmem:[%s3851_s4 + $0x220] sm:$0xff]  ;;  %v348_v55 = vld [vmem:[%s3851_s4 + $0x3c8] sm:$0xff] }
  0x3e   :  { %v2222_v15 = vpack.c.bf16 %v295_v3, %v286_v2  ;;  %v2236_v1 = vpack.c.bf16 %v348_v55, %v339_v54  ;;  %v357_v3 = vld [vmem:[%s3851_s4 + $0x410] sm:$0xff]  ;;  %v736_v54 = vld [vmem:[%s3855_s6 + $0x38] sm:$0xff]  ;;  %v753_v55 = vld [vmem:[%s3855_s6 + $0xc0] sm:$0xff] }
  0x40   :  { %2177 = vmatpush1.bf16.msra.mxu0 %v2176_v5  ;;  %2209 = vmatpush1.bf16.msra.mxu1 %v2208_v12  ;;  %v288_v5 = vld [vmem:[%s3851_s4 + $0x1e8] sm:$0xff]  ;;  %v285_v12 = vld [vmem:[%s3851_s4 + $0x1d0] sm:$0xff] }
  0x41   :  { %2211 = vmatprep.subr.bf16.mxu0 %v2210_v18  ;;  %2243 = vmatprep.subr.bf16.mxu1 %v2242_v20  ;;  %v2254_v17 = vpack.c.bf16 %v297_v8, %v288_v5  ;;  %v287_v18 = vld [vmem:[%s3851_s4 + $0x1e0] sm:$0xff]  ;;  %v296_v20 = vld [vmem:[%s3851_s4 + $0x228] sm:$0xff] }
  0xf6   :  { %v130_v21 = vpop.f32.mrb[0].mxu0  ;;  %v201_v23 = vpop.f32.mrb[0].mxu1 }
  0xf7   :  { %v206_v24 = vmul.f32 %v130_v21, %v130_v21  ;;  %v1852_v25 = vpop.f32.mrb[1].mxu0  ;;  %v1887_v26 = vpop.f32.mrb[1].mxu1  ;;  %v205_v31 = vsub.f32 %v2751_v30, %v130_v21  ;;  %v233_v30 = vld [vmem:[%s3851_s4 + $0x30] sm:$0xff]  ;;  %v304_v21 = vld [vmem:[%s3851_s4 + $0x268] sm:$0xff] }
  0xf8   :  { %v2244_v45 = vpack.c.bf16 %v242_v38, %v233_v30  ;;  %v315_v25 = vld [vmem:[%s3851_s4 + $0x2c0] sm:$0xff]  ;;  %v2224_v26 = vpack.c.bf16 %v294_v14, %v285_v12  ;;  %v324_v30 = vld [vmem:[%s3851_s4 + $0x308] sm:$0xff]  ;;  %v333_v38 = vld [vmem:[%s3851_s4 + $0x350] sm:$0xff] }
  0xf9   :  { %v207_v27 = vsub.f32 %v201_v23, %v206_v24  ;;  %v313_v23 = vld [vmem:[%s3851_s4 + $0x2b0] sm:$0xff]  ;;  %v306_v24 = vld [vmem:[%s3851_s4 + $0x278] sm:$0xff]  ;;  %v368_v12 = vld [vmem:[%s3851_s4 + $0x468] sm:$0xff] }
  0xfa   :  { %v745_v14 = vld [vmem:[%s3855_s6 + $0x80] sm:$0xff] }
  0xfb   :  { %v208_v28 = vadd.f32 1e-05, %v207_v27  ;;  %v2256_v27 = vpack.c.bf16 %v296_v20, %v287_v18  ;;  %v235_v20 = vld [vmem:[%s3851_s4 + $0x40] sm:$0xff] }
  0xfd   :  { %2551 = vrsqrt.f32 %v208_v28  ;;  %v303_v28 = vld [vmem:[%s3851_s4 + $0x260] sm:$0xff] }
 0x107   :  { %v2552_v33 = vpop.eup %2551 }
 0x108   :  { %v210_v37 = vmul.f32 %v2552_v33, %v205_v31  ;;  %v312_v31 = vld [vmem:[%s3851_s4 + $0x2a8] sm:$0xff]  ;;  %v2258_v33 = vpack.c.bf16 %v315_v25, %v306_v24  ;;  %v729_v24 = vld [vmem:[%s3855_s6] sm:$0xff] }
 0x109   :  { %v2228_v39 = vpack.c.bf16 %v312_v31, %v303_v28  ;;  %v730_v25 = vld [vmem:[%s3855_s6 + $0x8] sm:$0xff]  ;;  %v253_v31 = vld [vmem:[%s3851_s4 + $0xd0] sm:$0xff] }
 0x10a   :  { %v218_v43 = vmul.f32 %v1606_v32, %v210_v37  ;;  %v2226_v32 = vpack.c.bf16 %v313_v23, %v304_v21  ;;  %v331_v37 = vld [vmem:[%s3851_s4 + $0x340] sm:$0xff]  ;;  %v244_v21 = vld [vmem:[%s3851_s4 + $0x88] sm:$0xff] }
 0x10b   :  { %v2275_v28 = vpack.c.bf16 %v244_v21, %v235_v20  ;;  %v343_v20 = vld [vmem:[%s3851_s4 + $0x3a0] sm:$0xff]  ;;  %v352_v21 = vld [vmem:[%s3851_s4 + $0x3e8] sm:$0xff] }
 0x10c   :  { %v2991_v48 = vadd.f32 %v1607_v34, %v218_v43  ;;  %v305_v34 = vld [vmem:[%s3851_s4 + $0x270] sm:$0xff]  ;;  %v2230_v43 = vpack.c.bf16 %v331_v37, %v322_v36  ;;  %v732_v36 = vld [vmem:[%s3855_s6 + $0x18] sm:$0xff]  ;;  %v749_v37 = vld [vmem:[%s3855_s6 + $0xa0] sm:$0xff] }
 0x10d   :  { %v2260_v40 = vpack.c.bf16 %v314_v35, %v305_v34  ;;  %v731_v35 = vld [vmem:[%s3855_s6 + $0x10] sm:$0xff] }
 0x10e   :  { %436 = vmatmul.mubr.f32.vlgmr.msra.gmra.mrb[2].mxu0 %v2991_v48  ;;  %507 = vmatmul.mubr.f32.vlgmr.msra.gmra.mrb[2].mxu1 %v2991_v48  ;;  %v2304_v41 = vpack.c.bf16 %v732_v36, %v731_v35  ;;  %v760_v35 = vld [vmem:[%s3855_s6 + $0xf8] sm:$0xff] }
 0x10f   :  { %2213 = vmatpush1.bf16.msra.mxu0 %v2212_v44  ;;  %2245 = vmatpush1.bf16.msra.mxu1 %v2244_v45  ;;  %v2262_v44 = vpack.c.bf16 %v333_v38, %v324_v30  ;;  %v323_v45 = vld [vmem:[%s3851_s4 + $0x300] sm:$0xff]  ;;  %v750_v30 = vld [vmem:[%s3855_s6 + $0xa8] sm:$0xff] }
 0x110   :  { %2215 = vmatprep.subr.bf16.mxu0 %v2214_v49  ;;  %2247 = vmatprep.subr.bf16.mxu1 %v2246_v50  ;;  %v349_v49 = vld [vmem:[%s3851_s4 + $0x3d0] sm:$0xff]  ;;  %v342_v50 = vld [vmem:[%s3851_s4 + $0x398] sm:$0xff]  ;;  %v2264_v53 = vpack.c.bf16 %v332_v46, %v323_v45  ;;  %v2306_v42 = vpack.c.bf16 %v750_v30, %v749_v37 }
 0x111   :  { %577 = vmatprep.mubr.f32.mxu0 %v2562_v6  ;;  %648 = vmatprep.mubr.f32.mxu1 %v2562_v6  ;;  %v2234_v56 = vpack.c.bf16 %v349_v49, %v340_v47  ;;  %v751_v45 = vld [vmem:[%s3855_s6 + $0xb0] sm:$0xff]  ;;  %v752_v46 = vld [vmem:[%s3855_s6 + $0xb8] sm:$0xff] }
 0x112   :  { %v289_v49 = vld [vmem:[%s3851_s4 + $0x1f0] sm:$0xff]  ;;  %v744_v30 = vld [vmem:[%s3855_s6 + $0x78] sm:$0xff] }
 0x113   :  { %2217 = vmatpush1.bf16.msra.mxu0 %v2216_v57  ;;  %2249 = vmatpush1.bf16.msra.mxu1 %v2248_v58  ;;  %v2266_v57 = vpack.c.bf16 %v351_v51, %v342_v50  ;;  %v341_v58 = vld [vmem:[%s3851_s4 + $0x390] sm:$0xff]  ;;  %v298_v50 = vld [vmem:[%s3851_s4 + $0x238] sm:$0xff] }
 0x114   :  { %2219 = vmatprep.subr.bf16.mxu0 %v2218_v61  ;;  %2251 = vmatprep.subr.bf16.mxu1 %v2250_v62  ;;  %v367_v61 = vld [vmem:[%s3851_s4 + $0x460] sm:$0xff]  ;;  %v360_v62 = vld [vmem:[%s3851_s4 + $0x428] sm:$0xff]  ;;  %v2268_v2 = vpack.c.bf16 %v350_v59, %v341_v58  ;;  %v743_v37 = vld [vmem:[%s3855_s6 + $0x70] sm:$0xff] }
 0x115   :  { %v2238_v5 = vpack.c.bf16 %v367_v61, %v358_v60  ;;  %v2270_v8 = vpack.c.bf16 %v369_v63, %v360_v62  ;;  %v307_v58 = vld [vmem:[%s3851_s4 + $0x280] sm:$0xff]  ;;  %v316_v59 = vld [vmem:[%s3851_s4 + $0x2c8] sm:$0xff] }
 0x116   :  { %v737_v62 = vld [vmem:[%s3855_s6 + $0x40] sm:$0xff]  ;;  %v738_v63 = vld [vmem:[%s3855_s6 + $0x48] sm:$0xff] }
 0x117   :  { %2221 = vmatpush1.bf16.msra.mxu0 %v2220_v9  ;;  %2253 = vmatpush1.bf16.msra.mxu1 %v2252_v11  ;;  %v366_v9 = vld [vmem:[%s3851_s4 + $0x458] sm:$0xff]  ;;  %v359_v11 = vld [vmem:[%s3851_s4 + $0x420] sm:$0xff] }
 0x118   :  { %2223 = vmatprep.subr.bf16.mxu0 %v2222_v15  ;;  %2255 = vmatprep.subr.bf16.mxu1 %v2254_v17  ;;  %v746_v15 = vld [vmem:[%s3855_s6 + $0x88] sm:$0xff]  ;;  %v2240_v17 = vpack.c.bf16 %v366_v9, %v357_v3  ;;  %v2272_v18 = vpack.c.bf16 %v368_v12, %v359_v11  ;;  %v2287_v3 = vpack.c.bf16 %v316_v59, %v307_v58  ;;  %v739_v12 = vld [vmem:[%s3855_s6 + $0x50] sm:$0xff] }
 0x119   :  { %v2298_v23 = vpack.c.bf16 %v746_v15, %v745_v14  ;;  %v2316_v9 = vpack.c.bf16 %v738_v63, %v737_v62  ;;  %v740_v14 = vld [vmem:[%s3855_s6 + $0x58] sm:$0xff]  ;;  %v757_v15 = vld [vmem:[%s3855_s6 + $0xe0] sm:$0xff]  ;;  %v786_v63 = vld [vmem:[%s3855_s6 + $0x1c8] sm:$0xff] }
 0x11a   :  { %v785_v62 = vld [vmem:[%s3855_s6 + $0x1c0] sm:$0xff] }
 0x11b   :  { %2225 = vmatpush1.bf16.msra.mxu0 %v2224_v26  ;;  %2257 = vmatpush1.bf16.msra.mxu1 %v2256_v27  ;;  %v747_v26 = vld [vmem:[%s3855_s6 + $0x90] sm:$0xff]  ;;  %v748_v27 = vld [vmem:[%s3855_s6 + $0x98] sm:$0xff] }
 0x11c   :  { %2227 = vmatprep.subr.bf16.mxu0 %v2226_v32  ;;  %2259 = vmatprep.subr.bf16.mxu1 %v2258_v33  ;;  %v262_v32 = vld [vmem:[%s3851_s4 + $0x118] sm:$0xff]  ;;  %v2300_v33 = vpack.c.bf16 %v730_v25, %v729_v24  ;;  %v2302_v34 = vpack.c.bf16 %v748_v27, %v747_v26  ;;  %v741_v25 = vld [vmem:[%s3855_s6 + $0x60] sm:$0xff]  ;;  %v742_v26 = vld [vmem:[%s3855_s6 + $0x68] sm:$0xff]  ;;  %v2293_v27 = vpack.c.bf16 %v352_v21, %v343_v20 }
 0x11d   :  { %v2278_v38 = vpack.c.bf16 %v262_v32, %v253_v31  ;;  %v370_v31 = vld [vmem:[%s3851_s4 + $0x478] sm:$0xff]  ;;  %v2324_v32 = vpack.c.bf16 %v742_v26, %v741_v25  ;;  %v791_v26 = vld [vmem:[%s3855_s6 + $0x1f0] sm:$0xff] }
 0x11f   :  { %2229 = vmatpush1.bf16.msra.mxu0 %v2228_v39  ;;  %2261 = vmatpush1.bf16.msra.mxu1 %v2260_v40  ;;  %v271_v39 = vld [vmem:[%s3851_s4 + $0x160] sm:$0xff]  ;;  %v280_v40 = vld [vmem:[%s3851_s4 + $0x1a8] sm:$0xff] }
 0x120   :  { %2231 = vmatprep.subr.bf16.mxu0 %v2230_v43  ;;  %2263 = vmatprep.subr.bf16.mxu1 %v2262_v44  ;;  %v733_v43 = vld [vmem:[%s3855_s6 + $0x20] sm:$0xff]  ;;  %v734_v44 = vld [vmem:[%s3855_s6 + $0x28] sm:$0xff]  ;;  %v2281_v47 = vpack.c.bf16 %v280_v40, %v271_v39 }
 0x121   :  { %v2308_v51 = vpack.c.bf16 %v734_v44, %v733_v43  ;;  %v778_v39 = vld [vmem:[%s3855_s6 + $0x188] sm:$0xff]  ;;  %v779_v44 = vld [vmem:[%s3855_s6 + $0x190] sm:$0xff] }
 0x123   :  { %2233 = vmatpush1.bf16.msra.mxu0 %v2232_v52  ;;  %2265 = vmatpush1.bf16.msra.mxu1 %v2264_v53  ;;  %v2310_v52 = vpack.c.bf16 %v752_v46, %v751_v45  ;;  %v735_v53 = vld [vmem:[%s3855_s6 + $0x30] sm:$0xff]  ;;  %v780_v45 = vld [vmem:[%s3855_s6 + $0x198] sm:$0xff] }
 0x124   :  { %2235 = vmatprep.subr.bf16.mxu0 %v2234_v56  ;;  %2267 = vmatprep.subr.bf16.mxu1 %v2266_v57  ;;  %v754_v56 = vld [vmem:[%s3855_s6 + $0xc8] sm:$0xff]  ;;  %v2284_v57 = vpack.c.bf16 %v298_v50, %v289_v49  ;;  %v2312_v60 = vpack.c.bf16 %v736_v54, %v735_v53  ;;  %v763_v46 = vld [vmem:[%s3855_s6 + $0x110] sm:$0xff]  ;;  %v764_v49 = vld [vmem:[%s3855_s6 + $0x118] sm:$0xff] }
 0x125   :  { %v2314_v61 = vpack.c.bf16 %v754_v56, %v753_v55  ;;  %v781_v50 = vld [vmem:[%s3855_s6 + $0x1a0] sm:$0xff]  ;;  %v766_v55 = vld [vmem:[%s3855_s6 + $0x128] sm:$0xff]  ;;  %v783_v56 = vld [vmem:[%s3855_s6 + $0x1b0] sm:$0xff] }
 0x126   :  { %v765_v54 = vld [vmem:[%s3855_s6 + $0x120] sm:$0xff] }
 0x127   :  { %2237 = vmatpush1.bf16.msra.mxu0 %v2236_v1  ;;  %2269 = vmatpush1.bf16.msra.mxu1 %v2268_v2  ;;  %v755_v1 = vld [vmem:[%s3855_s6 + $0xd0] sm:$0xff]  ;;  %v756_v2 = vld [vmem:[%s3855_s6 + $0xd8] sm:$0xff]  ;;  %v2340_v58 = vpack.c.bf16 %v766_v55, %v765_v54 }
 0x128   :  { %2239 = vmatprep.subr.bf16.mxu0 %v2238_v5  ;;  %2271 = vmatprep.subr.bf16.mxu1 %v2270_v8  ;;  %v325_v5 = vld [vmem:[%s3851_s4 + $0x310] sm:$0xff]  ;;  %v334_v8 = vld [vmem:[%s3851_s4 + $0x358] sm:$0xff]  ;;  %v2318_v11 = vpack.c.bf16 %v756_v2, %v755_v1  ;;  %v2346_v2 = vpack.c.bf16 %v786_v63, %v785_v62  ;;  %v958_v62 = vld [vmem:[%s3857_s7 + $0x8] sm:$0xff] }
 0x129   :  { %v962_v63 = vld [vmem:[%s3857_s7 + $0x28] sm:$0xff] }
 0x12b   :  { %2241 = vmatpush1.bf16.msra.mxu0 %v2240_v17  ;;  %2273 = vmatpush1.bf16.msra.mxu1 %v2272_v18  ;;  %v758_v17 = vld [vmem:[%s3855_s6 + $0xe8] sm:$0xff]  ;;  %v2290_v18 = vpack.c.bf16 %v334_v8, %v325_v5  ;;  %v787_v8 = vld [vmem:[%s3855_s6 + $0x1d0] sm:$0xff] }
 0x12c   :  { %2274 = vmatprep.subr.bf16.mxu0 %v2560_v0  ;;  %2299 = vmatprep.subr.bf16.mxu1 %v2298_v23  ;;  %v2320_v23 = vpack.c.bf16 %v740_v14, %v739_v12  ;;  %v2322_v24 = vpack.c.bf16 %v758_v17, %v757_v15  ;;  %v770_v5 = vld [vmem:[%s3855_s6 + $0x148] sm:$0xff]  ;;  %v771_v14 = vld [vmem:[%s3855_s6 + $0x150] sm:$0xff]  ;;  %v772_v15 = vld [vmem:[%s3855_s6 + $0x158] sm:$0xff] }
 0x12d   :  { %v789_v17 = vld [vmem:[%s3855_s6 + $0x1e0] sm:$0xff]  ;;  %v2352_v20 = vpack.c.bf16 %v772_v15, %v771_v14  ;;  %v963_v14 = vld [vmem:[%s3857_s7 + $0x30] sm:$0xff]  ;;  %v966_v15 = vld [vmem:[%s3857_s7 + $0x48] sm:$0xff] }
 0x12e   :  { %578 = vmatmul.mubr.f32.vlgmr.msra.gmra.mrb[4].mxu0 %v2991_v48  ;;  %649 = vmatmul.mubr.f32.vlgmr.msra.gmra.mrb[4].mxu1 %v2991_v48 }
 0x12f   :  { %2276 = vmatpush3.bf16.msra.mxu0 %v2275_v28  ;;  %1920 = vmatprep.mubr.msk.f32.mxu0 %vm2561_vm0, %v2562_v6  ;;  %v361_v28 = vld [vmem:[%s3851_s4 + $0x430] sm:$0xff] }
 0x130   :  { %2277 = vmatprep.subr.bf16.mxu0 %v2560_v0  ;;  %2301 = vmatpush3.bf16.msra.mxu1 %v2300_v33  ;;  %v2296_v33 = vpack.c.bf16 %v370_v31, %v361_v28  ;;  %v775_v31 = vld [vmem:[%s3855_s6 + $0x170] sm:$0xff] }
 0x131   :  { %2303 = vmatprep.subr.bf16.mxu1 %v2302_v34  ;;  %v759_v34 = vld [vmem:[%s3855_s6 + $0xf0] sm:$0xff] }
 0x132   :  { %v2326_v36 = vpack.c.bf16 %v760_v35, %v759_v34 }
 0x133   :  { %2279 = vmatpush3.bf16.msra.mxu0 %v2278_v38  ;;  %v2328_v38 = vpack.c.bf16 %v744_v30, %v743_v37 }
 0x134   :  { %2280 = vmatprep.subr.bf16.mxu0 %v2560_v0  ;;  %2305 = vmatpush3.bf16.msra.mxu1 %v2304_v41  ;;  %v761_v41 = vld [vmem:[%s3855_s6 + $0x100] sm:$0xff] }
 0x135   :  { %2307 = vmatprep.subr.bf16.mxu1 %v2306_v42  ;;  %v762_v42 = vld [vmem:[%s3855_s6 + $0x108] sm:$0xff] }
 0x136   :  { %v2332_v43 = vpack.c.bf16 %v762_v42, %v761_v41 }
 0x137   :  { %2282 = vmatpush3.bf16.msra.mxu0 %v2281_v47  ;;  %v2334_v47 = vpack.c.bf16 %v780_v45, %v779_v44 }
 0x138   :  { %2283 = vmatprep.subr.bf16.mxu0 %v2560_v0  ;;  %2309 = vmatpush3.bf16.msra.mxu1 %v2308_v51  ;;  %v782_v51 = vld [vmem:[%s3855_s6 + $0x1a8] sm:$0xff] }
 0x139   :  { %2311 = vmatprep.subr.bf16.mxu1 %v2310_v52  ;;  %v2336_v52 = vpack.c.bf16 %v764_v49, %v763_v46  ;;  %v2338_v53 = vpack.c.bf16 %v782_v51, %v781_v50  ;;  %v1608_v50 = vld [vmem:[%s3856_s5] ss:$0 sm:$0xff] }
 0x13b   :  { %2285 = vmatpush3.bf16.msra.mxu0 %v2284_v57  ;;  %v784_v57 = vld [vmem:[%s3855_s6 + $0x1b8] sm:$0xff] }
 0x13c   :  { %2286 = vmatprep.subr.bf16.mxu0 %v2560_v0  ;;  %2313 = vmatpush3.bf16.msra.mxu1 %v2312_v60  ;;  %v2342_v59 = vpack.c.bf16 %v784_v57, %v783_v56  ;;  %v767_v60 = vld [vmem:[%s3855_s6 + $0x130] sm:$0xff] }
 0x13d   :  { %2315 = vmatprep.subr.bf16.mxu1 %v2314_v61  ;;  %v768_v61 = vld [vmem:[%s3855_s6 + $0x138] sm:$0xff] }
 0x13e   :  { %v2344_v1 = vpack.c.bf16 %v768_v61, %v767_v60 }
 0x13f   :  { %2288 = vmatpush3.bf16.msra.mxu0 %v2287_v3  ;;  %v769_v3 = vld [vmem:[%s3855_s6 + $0x140] sm:$0xff] }
 0x140   :  { %2289 = vmatprep.subr.bf16.mxu0 %v2560_v0  ;;  %2317 = vmatpush3.bf16.msra.mxu1 %v2316_v9  ;;  %v788_v9 = vld [vmem:[%s3855_s6 + $0x1d8] sm:$0xff] }
 0x141   :  { %2319 = vmatprep.subr.bf16.mxu1 %v2318_v11  ;;  %v2348_v11 = vpack.c.bf16 %v770_v5, %v769_v3  ;;  %v2350_v12 = vpack.c.bf16 %v788_v9, %v787_v8  ;;  %v964_v3 = vld [vmem:[%s3857_s7 + $0x38] sm:$0xff]  ;;  %v957_v5 = vld [vmem:[%s3857_s7] sm:$0xff] }
 0x142   :  { %v961_v8 = vld [vmem:[%s3857_s7 + $0x20] sm:$0xff] }
 0x143   :  { %2291 = vmatpush3.bf16.msra.mxu0 %v2290_v18  ;;  %v790_v18 = vld [vmem:[%s3855_s6 + $0x1e8] sm:$0xff] }
 0x144   :  { %2292 = vmatprep.subr.bf16.mxu0 %v2560_v0  ;;  %2321 = vmatpush3.bf16.msra.mxu1 %v2320_v23  ;;  %v2354_v21 = vpack.c.bf16 %v790_v18, %v789_v17  ;;  %v773_v23 = vld [vmem:[%s3855_s6 + $0x160] sm:$0xff]  ;;  %v970_v18 = vld [vmem:[%s3857_s7 + $0x68] sm:$0xff] }
 0x145   :  { %2323 = vmatprep.subr.bf16.mxu1 %v2322_v24  ;;  %v774_v24 = vld [vmem:[%s3855_s6 + $0x168] sm:$0xff] }
 0x146   :  { %v2356_v25 = vpack.c.bf16 %v774_v24, %v773_v23  ;;  %v2366_v23 = vpack.c.bf16 %v970_v18, %v966_v15  ;;  %v998_v15 = vld [vmem:[%s3857_s7 + $0x148] sm:$0xff]  ;;  %v1000_v18 = vld [vmem:[%s3857_s7 + $0x158] sm:$0xff] }
 0x147   :  { %2294 = vmatpush3.bf16.msra.mxu0 %v2293_v27  ;;  %v792_v27 = vld [vmem:[%s3855_s6 + $0x1f8] sm:$0xff] }
 0x148   :  { %2295 = vmatprep.subr.bf16.mxu0 %v2560_v0  ;;  %2325 = vmatpush3.bf16.msra.mxu1 %v2324_v32  ;;  %v2358_v28 = vpack.c.bf16 %v792_v27, %v791_v26  ;;  %v776_v32 = vld [vmem:[%s3855_s6 + $0x178] sm:$0xff]  ;;  %v969_v26 = vld [vmem:[%s3857_s7 + $0x60] sm:$0xff]  ;;  %v967_v27 = vld [vmem:[%s3857_s7 + $0x50] sm:$0xff] }
 0x149   :  { %2327 = vmatprep.subr.bf16.mxu1 %v2326_v36 }
 0x14b   :  { %2297 = vmatpush3.bf16.msra.mxu0 %v2296_v33  ;;  %v2360_v33 = vpack.c.bf16 %v776_v32, %v775_v31  ;;  %v971_v31 = vld [vmem:[%s3857_s7 + $0x70] sm:$0xff]  ;;  %v974_v32 = vld [vmem:[%s3857_s7 + $0x88] sm:$0xff] }
 0x14c   :  { %2329 = vmatpush3.bf16.msra.mxu1 %v2328_v38 }
 0x14e   :  { %1921 = vmatmul.mubr.f32.vlgmr.msra.gmra.mrb[6].mxu0 %v2991_v48  ;;  %v777_v48 = vld [vmem:[%s3855_s6 + $0x180] sm:$0xff] }
 0x14f   :  { %v2330_v40 = vpack.c.bf16 %v778_v39, %v777_v48 }
 0x151   :  { %2331 = vmatprep.subr.bf16.mxu0 %v2330_v40 }
 0x152   :  { %2333 = vmatpush3.bf16.msra.mxu0 %v2332_v43 }
 0x153   :  { %2335 = vmatprep.subr.bf16.mxu0 %v2334_v47 }
 0x156   :  { %2337 = vmatpush3.bf16.msra.mxu0 %v2336_v52 }
 0x157   :  { %2339 = vmatprep.subr.bf16.mxu0 %v2338_v53 }
 0x15a   :  { %2341 = vmatpush3.bf16.msra.mxu0 %v2340_v58 }
 0x15b   :  { %2343 = vmatprep.subr.bf16.mxu0 %v2342_v59 }
 0x15e   :  { %2345 = vmatpush3.bf16.msra.mxu0 %v2344_v1  ;;  %v960_v1 = vld [vmem:[%s3857_s7 + $0x18] sm:$0xff] }
 0x15f   :  { %2347 = vmatprep.subr.bf16.mxu0 %v2346_v2  ;;  %v2362_v2 = vpack.c.bf16 %v962_v63, %v958_v62  ;;  %v2394_v9 = vpack.c.bf16 %v964_v3, %v960_v1  ;;  %v996_v62 = vld [vmem:[%s3857_s7 + $0x138] sm:$0xff] }
 0x161   :  { %2363 = vmatprep.subr.bf16.mxu1 %v2362_v2 }
 0x162   :  { %2349 = vmatpush3.bf16.msra.mxu0 %v2348_v11  ;;  %v2364_v11 = vpack.c.bf16 %v961_v8, %v957_v5  ;;  %v989_v5 = vld [vmem:[%s3857_s7 + $0x100] sm:$0xff] }
 0x163   :  { %2351 = vmatprep.subr.bf16.mxu0 %v2350_v12  ;;  %v959_v12 = vld [vmem:[%s3857_s7 + $0x10] sm:$0xff]  ;;  %v993_v8 = vld [vmem:[%s3857_s7 + $0x120] sm:$0xff] }
 0x164   :  { %v2396_v17 = vpack.c.bf16 %v963_v14, %v959_v12  ;;  %v995_v12 = vld [vmem:[%s3857_s7 + $0x130] sm:$0xff] }
 0x166   :  { %2353 = vmatpush3.bf16.msra.mxu0 %v2352_v20  ;;  %v968_v20 = vld [vmem:[%s3857_s7 + $0x58] sm:$0xff] }
 0x167   :  { %2355 = vmatprep.subr.bf16.mxu0 %v2354_v21  ;;  %v972_v21 = vld [vmem:[%s3857_s7 + $0x78] sm:$0xff] }
 0x168   :  { %v2398_v24 = vpack.c.bf16 %v972_v21, %v968_v20  ;;  %v1004_v21 = vld [vmem:[%s3857_s7 + $0x178] sm:$0xff] }
 0x16a   :  { %2357 = vmatpush3.bf16.msra.mxu0 %v2356_v25  ;;  %v965_v25 = vld [vmem:[%s3857_s7 + $0x40] sm:$0xff] }
 0x16b   :  { %2359 = vmatprep.subr.bf16.mxu0 %v2358_v28  ;;  %v2368_v28 = vpack.c.bf16 %v969_v26, %v965_v25  ;;  %v2414_v25 = vpack.c.bf16 %v1004_v21, %v1000_v18  ;;  %v1177_v18 = vld [vmem:[%s3858_s8 + $0x38] sm:$0xff]  ;;  %v1178_v21 = vld [vmem:[%s3858_s8 + $0x40] sm:$0xff] }
 0x16e   :  { %2361 = vmatpush3.bf16.msra.mxu0 %v2360_v33  ;;  %v978_v33 = vld [vmem:[%s3857_s7 + $0xa8] sm:$0xff] }
 0x16f   :  { %2395 = vmatprep.subr.bf16.mxu0 %v2394_v9  ;;  %v991_v9 = vld [vmem:[%s3857_s7 + $0x110] sm:$0xff] }
 0x170   :  { %v2412_v14 = vpack.c.bf16 %v995_v12, %v991_v9  ;;  %v1172_v9 = vld [vmem:[%s3858_s8 + $0x10] sm:$0xff] }
 0x1e1   :  { %v437_v34 = vpop.f32.mrb[2].mxu0  ;;  %v508_v35 = vpop.f32.mrb[2].mxu1 }
 0x1e2   :  { %v726_v36 = vmul.f32 %v508_v35, %v437_v34  ;;  %v439_v37 = vpop.f32.mrb[3].mxu0  ;;  %v510_v30 = vpop.f32.mrb[3].mxu1  ;;  %v2370_v35 = vpack.c.bf16 %v978_v33, %v974_v32  ;;  %v1010_v33 = vld [vmem:[%s3857_s7 + $0x1a8] sm:$0xff] }
 0x1e3   :  { %v725_v38 = vmul.f32 %v439_v37, %v437_v34  ;;  %v727_v48 = vmul.f32 %v510_v30, %v437_v34  ;;  %v980_v37 = vld [vmem:[%s3857_s7 + $0xb8] sm:$0xff]  ;;  %v973_v30 = vld [vmem:[%s3857_s7 + $0x80] sm:$0xff] }
 0x1e4   :  { %864 = vmatprep.mubr.f32.mxu1 %v726_v36  ;;  %v976_v36 = vld [vmem:[%s3857_s7 + $0x98] sm:$0xff] }
 0x1e5   :  { %865 = vmatmul.mubr.f32.vlgmr.msra.gmra.mrb[6].mxu1 %v725_v38  ;;  %v2402_v38 = vpack.c.bf16 %v980_v37, %v976_v36 }
 0x1e6   :  { %1085 = vmatprep.mubr.f32.mxu1 %v2562_v6  ;;  %2365 = vmatpush1.bf16.msra.mxu1 %v2364_v11  ;;  %v2380_v11 = vpack.c.bf16 %v993_v8, %v989_v5 }
 0x1e7   :  { %2367 = vmatprep.subr.bf16.mxu1 %v2366_v23  ;;  %v997_v23 = vld [vmem:[%s3857_s7 + $0x140] sm:$0xff] }
 0x1ea   :  { %2369 = vmatpush1.bf16.msra.mxu1 %v2368_v28  ;;  %v1003_v28 = vld [vmem:[%s3857_s7 + $0x170] sm:$0xff] }
 0x1eb   :  { %2371 = vmatprep.subr.bf16.mxu1 %v2370_v35  ;;  %v1012_v35 = vld [vmem:[%s3857_s7 + $0x1b8] sm:$0xff] }
 0x201   :  { %v579_v39 = vpop.f32.mrb[4].mxu0  ;;  %v3401_v40 = vpop.f32.mrb[4].mxu1 }
 0x202   :  { %v728_v41 = vmul.f32 %v579_v39, %v437_v34  ;;  %v3403_v42 = vpop.f32.mrb[5].mxu0  ;;  %v3405_v43 = vpop.f32.mrb[5].mxu1  ;;  %v2400_v34 = vpack.c.bf16 %v971_v31, %v967_v27  ;;  %v975_v39 = vld [vmem:[%s3857_s7 + $0x90] sm:$0xff]  ;;  %v1006_v31 = vld [vmem:[%s3857_s7 + $0x188] sm:$0xff] }
 0x203   :  { %v999_v27 = vld [vmem:[%s3857_s7 + $0x150] sm:$0xff]  ;;  %v2386_v36 = vpack.c.bf16 %v1010_v33, %v1006_v31  ;;  %v1183_v31 = vld [vmem:[%s3858_s8 + $0x68] sm:$0xff] }
 0x204   :  { %934 = vmatprep.mubr.f32.mxu0 %v728_v41  ;;  %v979_v41 = vld [vmem:[%s3857_s7 + $0xb0] sm:$0xff]  ;;  %v2416_v32 = vpack.c.bf16 %v1003_v28, %v999_v27  ;;  %v1182_v28 = vld [vmem:[%s3858_s8 + $0x60] sm:$0xff] }
 0x205   :  { %935 = vmatmul.mubr.f32.vlgmr.msra.gmra.mrb[8].mxu0 %v727_v48  ;;  %v977_v48 = vld [vmem:[%s3857_s7 + $0xa0] sm:$0xff]  ;;  %v1184_v33 = vld [vmem:[%s3858_s8 + $0x70] sm:$0xff] }
 0x206   :  { %1156 = vmatprep.mubr.f32.mxu0 %v2562_v6  ;;  %2397 = vmatpush1.bf16.msra.mxu0 %v2396_v17  ;;  %v1002_v17 = vld [vmem:[%s3857_s7 + $0x168] sm:$0xff] }
 0x207   :  { %2399 = vmatprep.subr.bf16.mxu0 %v2398_v24  ;;  %v2382_v20 = vpack.c.bf16 %v1002_v17, %v998_v15  ;;  %v1001_v24 = vld [vmem:[%s3857_s7 + $0x160] sm:$0xff]  ;;  %v1176_v17 = vld [vmem:[%s3858_s8 + $0x30] sm:$0xff] }
 0x208   :  { %v2384_v26 = vpack.c.bf16 %v1001_v24, %v997_v23  ;;  %v1179_v23 = vld [vmem:[%s3858_s8 + $0x48] sm:$0xff] }
 0x209   :  { %v2439_v24 = vpack.c.bf16 %v1179_v23, %v1178_v21  ;;  %v1512_v21 = vld [vmem:[%s3861_s12 + $0x30] sm:$0xff]  ;;  %v1513_v23 = vld [vmem:[%s3861_s12 + $0x38] sm:$0xff] }
 0x20a   :  { %2401 = vmatpush1.bf16.msra.mxu0 %v2400_v34  ;;  %v1008_v34 = vld [vmem:[%s3857_s7 + $0x198] sm:$0xff] }
 0x20b   :  { %2403 = vmatprep.subr.bf16.mxu0 %v2402_v38  ;;  %v2418_v37 = vpack.c.bf16 %v1012_v35, %v1008_v34  ;;  %v1009_v38 = vld [vmem:[%s3857_s7 + $0x1a0] sm:$0xff]  ;;  %v1185_v34 = vld [vmem:[%s3858_s8 + $0x78] sm:$0xff] }
 0x20c   :  { %v2448_v35 = vpack.c.bf16 %v1185_v34, %v1184_v33  ;;  %v1518_v33 = vld [vmem:[%s3861_s12 + $0x60] sm:$0xff]  ;;  %v1519_v34 = vld [vmem:[%s3861_s12 + $0x68] sm:$0xff] }
 0x221   :  { %v3408_v44 = vpop.f32.mrb[6].mxu0 }
 0x222   :  { %v1922_v45 = vpop.f32.mrb[7].mxu0 }
 0x223   :  { %v2372_v45 = vpack.c.bf16 %v977_v48, %v973_v30  ;;  %v1005_v30 = vld [vmem:[%s3857_s7 + $0x180] sm:$0xff]  ;;  %v1007_v48 = vld [vmem:[%s3857_s7 + $0x190] sm:$0xff] }
 0x225   :  { %2373 = vmatpush1.bf16.msra.mxu1 %v2372_v45  ;;  %v1014_v45 = vld [vmem:[%s3857_s7 + $0x1c8] sm:$0xff] }
 0x2b8   :  { %v1695_v46 = vpop.f32.mrb[6].mxu1 }
 0x2b9   :  { %v1696_v47 = vpop.f32.mrb[7].mxu1 }
 0x2ba   :  { %v1697_v49 = vadd.f32 %v1696_v47, %v1695_v46  ;;  %v982_v46 = vld [vmem:[%s3857_s7 + $0xc8] sm:$0xff] }
 0x2bb   :  { %v986_v47 = vld [vmem:[%s3857_s7 + $0xe8] sm:$0xff] }
 0x2bc   :  { %v867_v53 = vadd.f32 %v1697_v49, %v1608_v50  ;;  %v984_v49 = vld [vmem:[%s3857_s7 + $0xd8] sm:$0xff] }
 0x2d8   :  { %v1730_v51 = vpop.f32.mrb[8].mxu0 }
 0x2d9   :  { %v1731_v52 = vpop.f32.mrb[9].mxu0 }
 0x2da   :  { %v1732_v54 = vadd.f32 %v1731_v52, %v1730_v51  ;;  %v2404_v51 = vpack.c.bf16 %v979_v41, %v975_v39  ;;  %v2374_v52 = vpack.c.bf16 %v986_v47, %v982_v46  ;;  %v2388_v39 = vpack.c.bf16 %v1009_v38, %v1005_v30  ;;  %v1011_v41 = vld [vmem:[%s3857_s7 + $0x1b0] sm:$0xff]  ;;  %v1018_v46 = vld [vmem:[%s3857_s7 + $0x1e8] sm:$0xff] }
 0x2db   :  { %v2420_v47 = vpack.c.bf16 %v1011_v41, %v1007_v48 }
 0x2dc   :  { %v937_v55 = vadd.f32 %v1732_v54, %v867_v53  ;;  %v988_v53 = vld [vmem:[%s3857_s7 + $0xf8] sm:$0xff]  ;;  %v981_v54 = vld [vmem:[%s3857_s7 + $0xc0] sm:$0xff]  ;;  %2405 = vmatpush1.bf16.msra.mxu0 %v2404_v51  ;;  %2375 = vmatprep.subr.bf16.mxu1 %v2374_v52 }
 0x2dd   :  { %v1016_v51 = vld [vmem:[%s3857_s7 + $0x1d8] sm:$0xff] }
 0x2de   :  { %940 = vrot.lane.b32.xlu0 %v937_v55, %s2563_s27  ;;  %v1020_v52 = vld [vmem:[%s3857_s7 + $0x1f8] sm:$0xff] }
 0x350   :  { %v941_v56 = vpop.permute.xlu0 %940 }
 0x351   :  { %v942_v57 = vmax.f32 %v937_v55, %v941_v56  ;;  %v2406_v56 = vpack.c.bf16 %v988_v53, %v984_v49  ;;  %v2390_v49 = vpack.c.bf16 %v1018_v46, %v1014_v45  ;;  %v1013_v53 = vld [vmem:[%s3857_s7 + $0x1c0] sm:$0xff] }
 0x353   :  { %943 = vrot.lane.b32.xlu0 %v942_v57, %s2564_s28  ;;  %2407 = vmatprep.subr.bf16.mxu0 %v2406_v56  ;;  %v1015_v56 = vld [vmem:[%s3857_s7 + $0x1d0] sm:$0xff] }
 0x3c5   :  { %v944_v58 = vpop.permute.xlu0 %943 }
 0x3c6   :  { %v945_v59 = vmax.f32 %v942_v57, %v944_v58  ;;  %v983_v57 = vld [vmem:[%s3857_s7 + $0xd0] sm:$0xff] }
 0x3c7   :  { %v987_v58 = vld [vmem:[%s3857_s7 + $0xf0] sm:$0xff] }
 0x3c8   :  { %v946_v60 = vsub.f32 %v937_v55, %v945_v59  ;;  %v985_v55 = vld [vmem:[%s3857_s7 + $0xe0] sm:$0xff]  ;;  %v990_v59 = vld [vmem:[%s3857_s7 + $0x108] sm:$0xff]  ;;  %v2408_v1 = vpack.c.bf16 %v987_v58, %v983_v57  ;;  %v1019_v57 = vld [vmem:[%s3857_s7 + $0x1f0] sm:$0xff] }
 0x3c9   :  { %v2376_v63 = vpack.c.bf16 %v985_v55, %v981_v54  ;;  %v2422_v54 = vpack.c.bf16 %v1020_v52, %v1016_v51  ;;  %v1017_v55 = vld [vmem:[%s3857_s7 + $0x1e0] sm:$0xff] }
 0x3ca   :  { %v947_v61 = vmul.f32 1.442695, %v946_v60  ;;  %v994_v60 = vld [vmem:[%s3857_s7 + $0x128] sm:$0xff]  ;;  %2409 = vmatpush1.bf16.msra.mxu0 %v2408_v1  ;;  %v2392_v58 = vpack.c.bf16 %v1017_v55, %v1013_v53  ;;  %v1170_v1 = vld [vmem:[%s3858_s8] sm:$0xff]  ;;  %v1418_v55 = vld [vmem:[%s3859_s10 + $0x30] sm:$0xff] }
 0x3cb   :  { %v2378_v2 = vpack.c.bf16 %v994_v60, %v990_v59  ;;  %2377 = vmatpush1.bf16.msra.mxu1 %v2376_v63  ;;  %v2424_v59 = vpack.c.bf16 %v1019_v57, %v1015_v56  ;;  %v1416_v52 = vld [vmem:[%s3859_s10 + $0x20] sm:$0xff]  ;;  %v1417_v53 = vld [vmem:[%s3859_s10 + $0x28] sm:$0xff]  ;;  %v1419_v56 = vld [vmem:[%s3859_s10 + $0x38] sm:$0xff] }
 0x3cc   :  { %2553 = vpow2.f32 %v947_v61  ;;  %v992_v61 = vld [vmem:[%s3857_s7 + $0x118] sm:$0xff]  ;;  %v2508_v57 = vpack.c.bf16 %v1419_v56, %v1418_v55 }
 0x3cd   :  { %v2410_v3 = vpack.c.bf16 %v996_v62, %v992_v61  ;;  %2379 = vmatprep.subr.bf16.mxu1 %v2378_v2  ;;  %v1171_v2 = vld [vmem:[%s3858_s8 + $0x8] sm:$0xff] }
 0x3ce   :  { %v2427_v5 = vpack.c.bf16 %v1171_v2, %v1170_v1  ;;  %v1425_v1 = vld [vmem:[%s3859_s10 + $0x68] sm:$0xff] }
 0x3cf   :  { %2411 = vmatprep.subr.bf16.mxu0 %v2410_v3  ;;  %2381 = vmatpush1.bf16.msra.mxu1 %v2380_v11  ;;  %v1173_v11 = vld [vmem:[%s3858_s8 + $0x18] sm:$0xff] }
 0x3d0   :  { %2413 = vmatpush1.bf16.msra.mxu0 %v2412_v14  ;;  %2383 = vmatprep.subr.bf16.mxu1 %v2382_v20  ;;  %v2430_v12 = vpack.c.bf16 %v1173_v11, %v1172_v9  ;;  %v1175_v14 = vld [vmem:[%s3858_s8 + $0x28] sm:$0xff]  ;;  %v2436_v20 = vpack.c.bf16 %v1177_v18, %v1176_v17  ;;  %v1506_v9 = vld [vmem:[%s3861_s12] sm:$0xff] }
 0x3d1   :  { %2415 = vmatprep.subr.bf16.mxu0 %v2414_v25  ;;  %v1180_v25 = vld [vmem:[%s3858_s8 + $0x50] sm:$0xff]  ;;  %v1507_v11 = vld [vmem:[%s3861_s12 + $0x8] sm:$0xff]  ;;  %v1510_v17 = vld [vmem:[%s3861_s12 + $0x20] sm:$0xff] }
 0x3d2   :  { %v1511_v18 = vld [vmem:[%s3861_s12 + $0x28] sm:$0xff] }
 0x3d3   :  { %2385 = vmatpush1.bf16.msra.mxu1 %v2384_v26  ;;  %v1181_v26 = vld [vmem:[%s3858_s8 + $0x58] sm:$0xff] }
 0x3d4   :  { %2417 = vmatpush1.bf16.msra.mxu0 %v2416_v32  ;;  %2387 = vmatprep.subr.bf16.mxu1 %v2386_v36  ;;  %v2442_v27 = vpack.c.bf16 %v1181_v26, %v1180_v25  ;;  %v2445_v32 = vpack.c.bf16 %v1183_v31, %v1182_v28  ;;  %v1514_v25 = vld [vmem:[%s3861_s12 + $0x40] sm:$0xff]  ;;  %v1515_v26 = vld [vmem:[%s3861_s12 + $0x48] sm:$0xff]  ;;  %v1516_v28 = vld [vmem:[%s3861_s12 + $0x50] sm:$0xff] }
 0x3d5   :  { %2419 = vmatprep.subr.bf16.mxu0 %v2418_v37  ;;  %v1517_v31 = vld [vmem:[%s3861_s12 + $0x58] sm:$0xff] }
 0x3d6   :  { %v3496_v50 = vpop.eup %2553 }
 0x3d7   :  { %949 = vrot.lane.b32.xlu1 %v3496_v50, %s2563_s27  ;;  %2389 = vmatpush1.bf16.msra.mxu1 %v2388_v39 }
 0x3d8   :  { %2421 = vmatpush1.bf16.msra.mxu0 %v2420_v47  ;;  %2391 = vmatprep.subr.bf16.mxu1 %v2390_v49 }
 0x3d9   :  { %2423 = vmatprep.subr.bf16.mxu0 %v2422_v54  ;;  %v2505_v54 = vpack.c.bf16 %v1417_v53, %v1416_v52 }
 0x3db   :  { %2393 = vmatpush1.bf16.msra.mxu1 %v2392_v58  ;;  %v1421_v58 = vld [vmem:[%s3859_s10 + $0x48] sm:$0xff] }
 0x3dc   :  { %2425 = vmatpush1.bf16.msra.mxu0 %v2424_v59  ;;  %2426 = vmatprep.subr.bf16.mxu1 %v2560_v0 }
 0x3dd   :  { %2450 = vmatprep.subr.bf16.mxu0 %v2560_v0 }
 0x449   :  { %v950_v60 = vpop.permute.xlu1 %949 }
 0x44a   :  { %v951_v61 = vadd.f32 %v3496_v50, %v950_v60  ;;  %v1422_v60 = vld [vmem:[%s3859_s10 + $0x50] sm:$0xff] }
 0x44c   :  { %952 = vrot.lane.b32.xlu1 %v951_v61, %s2564_s28 }
 0x4be   :  { %v953_v62 = vpop.permute.xlu1 %952 }
 0x4bf   :  { %v954_v63 = vadd.f32 %v953_v62, %v951_v61  ;;  %v1423_v61 = vld [vmem:[%s3859_s10 + $0x58] sm:$0xff] }
 0x4c0   :  { %v2514_v62 = vpack.c.bf16 %v1423_v61, %v1422_v60 }
 0x4c1   :  { %2555 = vrcp.f32 %v954_v63  ;;  %v1424_v63 = vld [vmem:[%s3859_s10 + $0x60] sm:$0xff] }
 0x4c2   :  { %v2517_v2 = vpack.c.bf16 %v1425_v1, %v1424_v63 }
 0x4cb   :  { %v2556_v3 = vpop.eup %2555 }
 0x4cc   :  { %v956_v8 = vmul.f32 %v2556_v3, %v3496_v50  ;;  %v1174_v50 = vld [vmem:[%s3858_s8 + $0x20] sm:$0xff]  ;;  %v1426_v3 = vld [vmem:[%s3859_s10 + $0x70] sm:$0xff] }
 0x4cd   :  { %v2433_v15 = vpack.c.bf16 %v1175_v14, %v1174_v50  ;;  %v2523_v50 = vpack.c.bf16 %v1507_v11, %v1506_v9  ;;  %v1509_v14 = vld [vmem:[%s3861_s12 + $0x18] sm:$0xff] }
 0x4ce   :  { %1086 = vmatmul.mubr.f32.vlgmr.msra.gmra.mrb[8].mxu1 %v956_v8  ;;  %1157 = vmatmul.mubr.f32.vlgmr.msra.gmra.mrb[10].mxu0 %v956_v8 }
 0x4cf   :  { %2428 = vmatpush3.bf16.msra.mxu1 %v2427_v5  ;;  %1955 = vmatprep.mubr.msk.f32.mxu1 %vm2561_vm0, %v2562_v6  ;;  %v1427_v5 = vld [vmem:[%s3859_s10 + $0x78] sm:$0xff] }
 0x4d0   :  { %2429 = vmatprep.subr.bf16.mxu1 %v2560_v0  ;;  %2452 = vmatpush3.bf16.msra.mxu0 %v2651_v4  ;;  %v2520_v8 = vpack.c.bf16 %v1427_v5, %v1426_v3 }
 0x4d1   :  { %2453 = vmatprep.subr.bf16.mxu0 %v2560_v0  ;;  %1990 = vmatprep.mubr.msk.f32.mxu0 %vm2561_vm0, %v2562_v6 }
 0x4d3   :  { %2431 = vmatpush3.bf16.msra.mxu1 %v2430_v12  ;;  %v1508_v12 = vld [vmem:[%s3861_s12 + $0x10] sm:$0xff] }
 0x4d4   :  { %2432 = vmatprep.subr.bf16.mxu1 %v2560_v0  ;;  %2455 = vmatpush3.bf16.msra.mxu0 %v2662_v7 }
 0x4d5   :  { %2456 = vmatprep.subr.bf16.mxu0 %v2560_v0 }
 0x4d7   :  { %2434 = vmatpush3.bf16.msra.mxu1 %v2433_v15  ;;  %v2526_v15 = vpack.c.bf16 %v1509_v14, %v1508_v12 }
 0x4d8   :  { %2435 = vmatprep.subr.bf16.mxu1 %v2560_v0  ;;  %2458 = vmatpush3.bf16.msra.mxu0 %v2674_v10 }
 0x4d9   :  { %2459 = vmatprep.subr.bf16.mxu0 %v2560_v0 }
 0x4db   :  { %2437 = vmatpush3.bf16.msra.mxu1 %v2436_v20  ;;  %v2529_v20 = vpack.c.bf16 %v1511_v18, %v1510_v17 }
 0x4dc   :  { %2438 = vmatprep.subr.bf16.mxu1 %v2560_v0  ;;  %2461 = vmatpush3.bf16.msra.mxu0 %v2686_v13 }
 0x4dd   :  { %2462 = vmatprep.subr.bf16.mxu0 %v2560_v0 }
 0x4df   :  { %2440 = vmatpush3.bf16.msra.mxu1 %v2439_v24  ;;  %v2532_v24 = vpack.c.bf16 %v1513_v23, %v1512_v21 }
 0x4e0   :  { %2441 = vmatprep.subr.bf16.mxu1 %v2560_v0  ;;  %2464 = vmatpush3.bf16.msra.mxu0 %v2698_v16 }
 0x4e1   :  { %2465 = vmatprep.subr.bf16.mxu0 %v2560_v0 }
 0x4e3   :  { %2443 = vmatpush3.bf16.msra.mxu1 %v2442_v27  ;;  %v2535_v27 = vpack.c.bf16 %v1515_v26, %v1514_v25 }
 0x4e4   :  { %2444 = vmatprep.subr.bf16.mxu1 %v2560_v0  ;;  %2467 = vmatpush3.bf16.msra.mxu0 %v2710_v19 }
 0x4e5   :  { %2468 = vmatprep.subr.bf16.mxu0 %v2560_v0 }
 0x4e7   :  { %2446 = vmatpush3.bf16.msra.mxu1 %v2445_v32  ;;  %v2538_v32 = vpack.c.bf16 %v1517_v31, %v1516_v28 }
 0x4e8   :  { %2470 = vmatpush3.bf16.msra.mxu0 %v2722_v22  ;;  %2447 = vmatprep.subr.bf16.mxu1 %v2560_v0 }
 0x4e9   :  { %2471 = vmatprep.subr.bf16.mxu0 %v2560_v0 }
 0x4eb   :  { %2449 = vmatpush3.bf16.msra.mxu1 %v2448_v35  ;;  %v2541_v35 = vpack.c.bf16 %v1519_v34, %v1518_v33 }
 0x4ec   :  { %2473 = vmatpush3.bf16.msra.mxu0 %v2746_v29  ;;  %2474 = vmatprep.subr.bf16.mxu1 %v2560_v0 }
 0x4ed   :  { %2498 = vmatprep.subr.bf16.mxu0 %v2560_v0 }
 0x5a1   :  { %v1087_v36 = vpop.f32.mrb[8].mxu1  ;;  %v1158_v37 = vpop.f32.mrb[10].mxu0 }
 0x5a2   :  { %v1163_v30 = vmul.f32 %v1087_v36, %v3403_v42  ;;  %v1165_v38 = vmul.f32 %v1158_v37, %v3405_v43  ;;  %v1089_v48 = vpop.f32.mrb[9].mxu1  ;;  %v1160_v39 = vpop.f32.mrb[11].mxu0  ;;  %v1414_v42 = vld [vmem:[%s3859_s10 + $0x10] sm:$0xff]  ;;  %v1415_v43 = vld [vmem:[%s3859_s10 + $0x18] sm:$0xff] }
 0x5a3   :  { %v1164_v41 = vmul.f32 %v1089_v48, %v3401_v40  ;;  %v1166_v45 = vmul.f32 %v1160_v39, %v3408_v44  ;;  %v2502_v51 = vpack.c.bf16 %v1415_v43, %v1414_v42 }
 0x5a5   :  { %v1167_v46 = vadd.f32 %v1164_v41, %v1163_v30  ;;  %v1168_v47 = vadd.f32 %v1166_v45, %v1165_v38 }
 0x5a7   :  { %v1169_v49 = vadd.f32 %v1168_v47, %v1167_v46 }
 0x5a9   :  { %1956 = vmatmul.mubr.f32.vlgmr.msra.gmra.mrb[10].mxu1 %v1169_v49  ;;  %v1520_v49 = vld [vmem:[%s3861_s12 + $0x70] sm:$0xff] }
 0x5aa   :  { %2476 = vmatpush3.bf16.msra.mxu1 %v2651_v4  ;;  %2025 = vmatprep.mubr.msk.f32.mxu1 %vm2561_vm0, %v2562_v6  ;;  %v1412_v4 = vld [vmem:[%s3859_s10] sm:$0xff] }
 0x5ab   :  { %2477 = vmatprep.subr.bf16.mxu1 %v2560_v0 }
 0x5ae   :  { %2479 = vmatpush3.bf16.msra.mxu1 %v2662_v7  ;;  %v1413_v7 = vld [vmem:[%s3859_s10 + $0x8] sm:$0xff] }
 0x5af   :  { %2480 = vmatprep.subr.bf16.mxu1 %v2560_v0 }
 0x5b2   :  { %2482 = vmatpush3.bf16.msra.mxu1 %v2674_v10 }
 0x5b3   :  { %2483 = vmatprep.subr.bf16.mxu1 %v2560_v0 }
 0x5b6   :  { %2485 = vmatpush3.bf16.msra.mxu1 %v2686_v13  ;;  %v1609_v13 = vld [vmem:[%s3860_s9] ss:$0 sm:$0xff] }
 0x5b7   :  { %2486 = vmatprep.subr.bf16.mxu1 %v2560_v0 }
 0x5ba   :  { %2488 = vmatpush3.bf16.msra.mxu1 %v2698_v16  ;;  %v2559_v16 = vld [vmem:[%s3852_s0] sm:$0xff] }
 0x5bb   :  { %2489 = vmatprep.subr.bf16.mxu1 %v2560_v0 }
 0x5be   :  { %2491 = vmatpush3.bf16.msra.mxu1 %v2710_v19 }
 0x5bf   :  { %2492 = vmatprep.subr.bf16.mxu1 %v2560_v0 }
 0x5c2   :  { %2494 = vmatpush3.bf16.msra.mxu1 %v2722_v22 }
 0x5c3   :  { %2495 = vmatprep.subr.bf16.mxu1 %v2560_v0 }
 0x5c6   :  { %2497 = vmatpush3.bf16.msra.mxu1 %v2746_v29  ;;  %v2499_v29 = vpack.c.bf16 %v1413_v7, %v1412_v4  ;;  %v1610_v7 = vld [vmem:[%s3862_s11] ss:$0 sm:$0xff] }
 0x5c7   :  { %2522 = vmatprep.subr.bf16.mxu1 %v2560_v0 }
 0x67c   :  { %v1252_v10 = vpop.f32.mrb[10].mxu1 }
 0x67d   :  { %v1256_v19 = vadd.f32 %v2559_v16, %v1252_v10  ;;  %v1957_v22 = vpop.f32.mrb[11].mxu1 }
 0x67f   :  { %v3726_v40 = vadd.f32 %v1609_v13, %v1256_v19 }
 0x681   :  { %1991 = vmatmul.mubr.f32.vlgmr.msra.gmra.mrb[12].mxu0 %v3726_v40  ;;  %v1335_v44 = vmul.f32 %v3726_v40, %v3726_v40 }
 0x682   :  { %2500 = vmatpush3.bf16.msra.mxu0 %v2499_v29  ;;  %2060 = vmatprep.mubr.msk.f32.mxu0 %vm2561_vm0, %v2562_v6  ;;  %v1611_v29 = vld [vmem:[%s3863_s13] ss:$0 sm:$0xff] }
 0x683   :  { %2026 = vmatmul.mubr.f32.vlgmr.msra.gmra.mrb[12].mxu1 %v1335_v44  ;;  %2501 = vmatprep.subr.bf16.mxu0 %v2560_v0 }
 0x684   :  { %2095 = vmatprep.mubr.msk.f32.mxu1 %vm2561_vm0, %v2562_v6  ;;  %v1420_v6 = vld [vmem:[%s3859_s10 + $0x40] sm:$0xff]  ;;  %2524 = vmatpush3.bf16.msra.mxu1 %v2523_v50 }
 0x685   :  { %v2511_v59 = vpack.c.bf16 %v1421_v58, %v1420_v6  ;;  %2525 = vmatprep.subr.bf16.mxu1 %v2560_v0 }
 0x686   :  { %2503 = vmatpush3.bf16.msra.mxu0 %v2502_v51 }
 0x687   :  { %2504 = vmatprep.subr.bf16.mxu0 %v2560_v0 }
 0x688   :  { %2527 = vmatpush3.bf16.msra.mxu1 %v2526_v15 }
 0x689   :  { %2528 = vmatprep.subr.bf16.mxu1 %v2560_v0 }
 0x68a   :  { %2506 = vmatpush3.bf16.msra.mxu0 %v2505_v54 }
 0x68b   :  { %2507 = vmatprep.subr.bf16.mxu0 %v2560_v0 }
 0x68c   :  { %2530 = vmatpush3.bf16.msra.mxu1 %v2529_v20 }
 0x68d   :  { %2531 = vmatprep.subr.bf16.mxu1 %v2560_v0 }
 0x68e   :  { %2509 = vmatpush3.bf16.msra.mxu0 %v2508_v57 }
 0x68f   :  { %2510 = vmatprep.subr.bf16.mxu0 %v2560_v0 }
 0x690   :  { %2533 = vmatpush3.bf16.msra.mxu1 %v2532_v24 }
 0x691   :  { %2534 = vmatprep.subr.bf16.mxu1 %v2560_v0 }
 0x692   :  { %2512 = vmatpush3.bf16.msra.mxu0 %v2511_v59 }
 0x693   :  { %2513 = vmatprep.subr.bf16.mxu0 %v2560_v0 }
 0x694   :  { %2536 = vmatpush3.bf16.msra.mxu1 %v2535_v27 }
 0x695   :  { %2537 = vmatprep.subr.bf16.mxu1 %v2560_v0 }
 0x696   :  { %2515 = vmatpush3.bf16.msra.mxu0 %v2514_v62 }
 0x697   :  { %2516 = vmatprep.subr.bf16.mxu0 %v2560_v0 }
 0x698   :  { %2539 = vmatpush3.bf16.msra.mxu1 %v2538_v32 }
 0x699   :  { %2540 = vmatprep.subr.bf16.mxu1 %v2560_v0 }
 0x69a   :  { %2518 = vmatpush3.bf16.msra.mxu0 %v2517_v2 }
 0x69b   :  { %2519 = vmatprep.subr.bf16.mxu0 %v2560_v0 }
 0x69c   :  { %2542 = vmatpush3.bf16.msra.mxu1 %v2541_v35 }
 0x69d   :  { %2543 = vmatprep.subr.bf16.mxu1 %v2560_v0  ;;  %v1521_v0 = vld [vmem:[%s3861_s12 + $0x78] sm:$0xff] }
 0x69e   :  { %2521 = vmatpush3.bf16.msra.mxu0 %v2520_v8  ;;  %v2544_v4 = vpack.c.bf16 %v1521_v0, %v1520_v49 }
 0x6a0   :  { %2545 = vmatpush3.bf16.msra.mxu1 %v2544_v4 }
 0x754   :  { %v1331_v36 = vpop.f32.mrb[12].mxu0 }
 0x755   :  { %v1407_v37 = vmul.f32 %v1331_v36, %v1331_v36  ;;  %v1992_v30 = vpop.f32.mrb[13].mxu0  ;;  %v1406_v45 = vsub.f32 %v3726_v40, %v1331_v36 }
 0x756   :  { %v1402_v38 = vpop.f32.mrb[12].mxu1 }
 0x757   :  { %v1408_v48 = vsub.f32 %v1402_v38, %v1407_v37  ;;  %v2027_v39 = vpop.f32.mrb[13].mxu1 }
 0x759   :  { %v1409_v41 = vadd.f32 1e-05, %v1408_v48 }
 0x75b   :  { %2557 = vrsqrt.f32 %v1409_v41 }
 0x765   :  { %v2558_v46 = vpop.eup %2557 }
 0x766   :  { %v1411_v47 = vmul.f32 %v2558_v46, %v1406_v45 }
 0x768   :  { %2061 = vmatmul.mubr.f32.vlgmr.msra.gmra.mrb[14].mxu0 %v1411_v47 }
 0x83b   :  { %v1501_v10 = vpop.f32.mrb[14].mxu0 }
 0x83c   :  { %v1502_v13 = vadd.f32 %v1610_v7, %v1501_v10  ;;  %v2062_v16 = vpop.f32.mrb[15].mxu0 }
 0x83e   :  { %v1505_v19 = vmax.f32 %v1502_v13, 0.0 }
 0x840   :  { %2096 = vmatmul.mubr.f32.vlgmr.msra.gmra.mrb[14].mxu1 %v1505_v19 }
 0x913   :  { %v1588_v22 = vpop.f32.mrb[14].mxu1 }
 0x914   :  { %v1592_v42 = vadd.f32 %v1588_v22, %v3726_v40  ;;  %v2097_v43 = vpop.f32.mrb[15].mxu1 }
 0x916   :  { %v1600_v44 = vadd.f32 %v1611_v29, %v1592_v42 }
 0x918   :  { %1601 = vst [vmem:[%s3864_s14] sm:$0xff] %v1600_v44 }

</bundles_post_ra>
